<compile_context>
chip_gen: v5e
topology: v5e:2x2
jax: 0.10.0
libtpu: 0.0.40
codegen_flags: <defaults>
</compile_context>

<pallas_src>
import functools

import jax
import jax.numpy as jnp
from jax.experimental import pallas as pl
from jax.experimental.pallas import tpu as pltpu


# ----------------------------------------------------------------------------
# Kernels
# ----------------------------------------------------------------------------

def _heads_attn_kernel(f1_ref, f2_ref, hkT_ref, maskT_ref, out_ref, acc_ref,
                       *, alpha, nhid, nheads):
    """Multi-head layer, transposed aggregation.

    Grid = (qi, kj).  The head loop is unrolled inside so the (T, T) mask tile
    is DMA'd once per (qi, kj) and reused by every head.

      acc[h, d, i] += sum_j h_aug[h, j, d] * e[h, i, j]   (== (e @ h_aug)^T)
    """
    kj = pl.program_id(1)

    @pl.when(kj == 0)
    def _init():
        acc_ref[...] = jnp.zeros_like(acc_ref)

    # Transposed 0/1 edge mask tile: maskT[j, i] == (adj[i, j] != 0).
    edge = maskT_ref[...] != 0

    for h in range(nheads):                   # static unroll; nheads is small
        f1 = f1_ref[h]                        # (1, Tq)  a1 . h_i  (query side)
        f2 = f2_ref[h]                        # (Tk, 1)  a2 . h_j  (key side)
        logits = f2 + f1                      # (Tk, Tq)  == logits^T
        # exp(-leakyrelu(x)); maximum(x, alpha*x) == leakyrelu(x) for 0<alpha<1.
        # Single select on the int8 mask (no astype+mul; no inf*0 NaN).  No
        # extra stabilization, exactly as the pyGAT reference.
        eT = jnp.where(edge,
                       jnp.exp(-jnp.maximum(logits, alpha * logits)),
                       0.0)
        # Numerator and rowsum in one narrow MXU matmul (hkT carries a ones row).
        acc_ref[h] = acc_ref[h] + jnp.dot(
            hkT_ref[h], eT.astype(jnp.bfloat16),
            preferred_element_type=jnp.float32)

    @pl.when(kj == pl.num_programs(1) - 1)
    def _finalize():
        acc = acc_ref[...]                            # (H, nhid+1, Tq)
        rowsum = acc[:, nhid:nhid + 1, :]
        rowsum = jnp.where(rowsum == 0.0, 1.0, rowsum)  # isolated / padded rows
        h_prime = acc[:, :nhid, :] / rowsum
        # concat=True head: F.elu applied inside the layer.  Lane-dense store.
        out_ref[...] = jnp.where(h_prime > 0.0, h_prime, jnp.exp(h_prime) - 1.0)


def _out_attn_kernel(g1_ref, g2_ref, hkT_ref, maskT_ref, out_ref, acc_ref,
                     *, alpha, nclass):
    """Output layer (concat=False) + F.elu + log_softmax, transposed aggregation."""
    kj = pl.program_id(1)

    @pl.when(kj == 0)
    def _init():
        acc_ref[...] = jnp.zeros_like(acc_ref)

    logits = g2_ref[...] + g1_ref[...]                # (Tk,1)+(1,Tq) -> (Tk,Tq)
    eT = jnp.where(maskT_ref[...] != 0,
                   jnp.exp(-jnp.maximum(logits, alpha * logits)),
                   0.0)
    acc_ref[...] += jnp.dot(hkT_ref[...], eT.astype(jnp.bfloat16),
                            preferred_element_type=jnp.float32)

    @pl.when(kj == pl.num_programs(1) - 1)
    def _finalize():
        acc = acc_ref[...]                            # (nclass+1, Tq)
        rowsum = acc[nclass:nclass + 1, :]
        rowsum = jnp.where(rowsum == 0.0, 1.0, rowsum)
        h_prime = acc[:nclass, :] / rowsum            # (nclass, Tq)
        y = jnp.where(h_prime > 0.0, h_prime, jnp.exp(h_prime) - 1.0)   # F.elu
        # log_softmax over classes (sublane axis; tiny cross-sublane reduce).
        m = jnp.max(y, axis=0, keepdims=True)
        z = y - m
        lse = jnp.log(jnp.sum(jnp.exp(z), axis=0, keepdims=True))
        out_ref[...] = z - lse


# ----------------------------------------------------------------------------
# Wrapper
# ----------------------------------------------------------------------------

def _round_up(x, m):
    return ((x + m - 1) // m) * m


def _attention_tiles(n, max_tile=512):
    # Single square tile size that divides the padded N.  T<=512 keeps the f32
    # (T,T) e intermediates plus double-buffered int8 mask tiles well inside
    # even v7x's 64 MiB VMEM (32 MiB scoped); small graphs collapse to one
    # 128-aligned tile.
    t = min(max_tile, _round_up(n, 128))
    return _round_up(n, t), t


def spgat_forward(x, adj, W_heads, a_heads, W_out, a_out, *, alpha=0.2,
                  max_tile=512):
    """SpGAT forward pass (inference: dropout = identity).

    x:       (N, nfeat) f32
    adj:     (N, N)     any dtype; nonzero entry == edge
    W_heads: (nheads, nfeat, nhid)
    a_heads: (nheads, 2, nhid)   -- [a1 ; a2] per head
    W_out:   (nhid*nheads, nclass)
    a_out:   (2, nclass)
    returns: (N, nclass) log-probabilities
    """
    N, _ = x.shape
    nheads, _, nhid = W_heads.shape
    nclass = W_out.shape[1]

    n_pad, T = _attention_tiles(N, max_tile)
    nq = n_pad // T
    nk = n_pad // T
    pad = n_pad - N

    x_p = jnp.pad(x.astype(jnp.float32), ((0, pad), (0, 0)))
    # Transposed int8 0/1 edge mask (maskT[j, i] = adj[i, j] != 0), shared by
    # both layers.  int8 = 4x less DMA / VMEM than f32 adj; streamed once per
    # layer since the head loop lives inside the kernel.
    maskT = jnp.pad((adj.T != 0).astype(jnp.int8), ((0, pad), (0, pad)))

    # ---- layer 1: per-head projection + attention coefficients in XLA ------
    # (hoisted out of the attention grid; O(N*F) work, done once)
    h_heads = jnp.einsum('nf,hfd->hnd', x_p, W_heads.astype(jnp.float32))
    f1 = jnp.einsum('hnd,hd->hn', h_heads, a_heads[:, 0, :].astype(jnp.float32))
    f2 = jnp.einsum('hnd,hd->hn', h_heads, a_heads[:, 1, :].astype(jnp.float32))
    f1 = f1[:, None, :]                              # (H, 1, Np)  query side
    f2 = f2[:, :, None]                              # (H, Np, 1)  key side
    # Pre-transposed bf16 aggregation operand with an appended ones row
    # (folds rowsum into the same matmul): (H, nhid+1, Np).
    hkT = jnp.concatenate(
        [jnp.transpose(h_heads, (0, 2, 1)),
         jnp.ones((nheads, 1, n_pad), jnp.float32)], axis=1
    ).astype(jnp.bfloat16)

    cost_heads = pl.CostEstimate(
        flops=int(nheads * n_pad * n_pad * (2 * (nhid + 1) + 6)),
        transcendentals=int(nheads * n_pad * n_pad),
        bytes_accessed=int(n_pad * n_pad                                # mask once
                           + nq * nheads * (nhid + 1) * n_pad * 2       # hkT restream
                           + (nq + nk) * nheads * n_pad * 4             # f1 / f2
                           + nheads * nhid * n_pad * 4))                # output

    heads_out = pl.pallas_call(
        functools.partial(_heads_attn_kernel, alpha=alpha, nhid=nhid,
                          nheads=nheads),
        out_shape=jax.ShapeDtypeStruct((nheads, nhid, n_pad), jnp.float32),
        grid=(nq, nk),
        in_specs=[
            pl.BlockSpec((nheads, 1, T), lambda qi, kj: (0, 0, qi)),          # f1
            pl.BlockSpec((nheads, T, 1), lambda qi, kj: (0, kj, 0)),          # f2
            pl.BlockSpec((nheads, nhid + 1, T), lambda qi, kj: (0, 0, kj)),   # hkT
            pl.BlockSpec((T, T), lambda qi, kj: (kj, qi)),                    # maskT
        ],
        out_specs=pl.BlockSpec((nheads, nhid, T), lambda qi, kj: (0, 0, qi)),
        scratch_shapes=[pltpu.VMEM((nheads, nhid + 1, T), jnp.float32)],
        compiler_params=pltpu.CompilerParams(
            dimension_semantics=("parallel", "arbitrary"),
            vmem_limit_bytes=32 * 1024 * 1024),
        cost_estimate=cost_heads,
    )(f1, f2, hkT, maskT)

    # ---- layer 2: torch.cat(heads, dim=1) @ W_out folded into one einsum ---
    # (heads_out is (H, nhid, Np); no transpose of the big head output needed)
    W_out_r = W_out.astype(jnp.float32).reshape(nheads, nhid, nclass)
    h2 = jnp.einsum('hdn,hdc->nc', heads_out, W_out_r)          # (Np, nclass)
    g1 = (h2 @ a_out[0].astype(jnp.float32))[None, :]           # (1, Np)
    g2 = (h2 @ a_out[1].astype(jnp.float32))[:, None]           # (Np, 1)
    h2T = jnp.concatenate(
        [h2.T, jnp.ones((1, n_pad), jnp.float32)], axis=0
    ).astype(jnp.bfloat16)                                      # (nclass+1, Np)

    cost_out = pl.CostEstimate(
        flops=int(n_pad * n_pad * (2 * (nclass + 1) + 6)),
        transcendentals=int(n_pad * n_pad),
        bytes_accessed=int(n_pad * n_pad
                           + nq * (nclass + 1) * n_pad * 2
                           + (nq + nk) * n_pad * 4
                           + nclass * n_pad * 4))

    out_p = pl.pallas_call(
        functools.partial(_out_attn_kernel, alpha=alpha, nclass=nclass),
        out_shape=jax.ShapeDtypeStruct((nclass, n_pad), jnp.float32),
        grid=(nq, nk),
        in_specs=[
            pl.BlockSpec((1, T), lambda qi, kj: (0, qi)),                     # g1
            pl.BlockSpec((T, 1), lambda qi, kj: (kj, 0)),                     # g2
            pl.BlockSpec((nclass + 1, T), lambda qi, kj: (0, kj)),            # h2T
            pl.BlockSpec((T, T), lambda qi, kj: (kj, qi)),                    # maskT
        ],
        out_specs=pl.BlockSpec((nclass, T), lambda qi, kj: (0, qi)),
        scratch_shapes=[pltpu.VMEM((nclass + 1, T), jnp.float32)],
        compiler_params=pltpu.CompilerParams(
            dimension_semantics=("parallel", "arbitrary"),
            vmem_limit_bytes=32 * 1024 * 1024),
        cost_estimate=cost_out,
    )(g1, g2, h2T, maskT)

    # (nclass, Np) -> (N, nclass): one tiny XLA transpose of the final logits.
    return out_p[:, :N].T


# ----------------------------------------------------------------------------
# Pure-jnp f32 reference (mirrors the PyTorch module at inference)
# ----------------------------------------------------------------------------

def _reference_forward(x, adj, W_heads, a_heads, W_out, a_out, alpha):
    def layer(xin, W, a1, a2):
        h = xin @ W
        logits = (h @ a1[:, None]) + (h @ a2[:, None]).T
        e = jnp.exp(-jnp.where(logits > 0, logits, alpha * logits))
        e = jnp.where(adj != 0, e, 0.0)
        rowsum = jnp.sum(e, axis=-1, keepdims=True)
        return (e @ h) / rowsum

    heads = [jax.nn.elu(layer(x, W_heads[h], a_heads[h, 0], a_heads[h, 1]))
             for h in range(W_heads.shape[0])]
    xc = jnp.concatenate(heads, axis=1)
    y = jax.nn.elu(layer(xc, W_out, a_out[0], a_out[1]))
    return jax.nn.log_softmax(y, axis=1)


# ----------------------------------------------------------------------------
# Demo
# ----------------------------------------------------------------------------

if __name__ == "__main__":
    # Small shapes consistent with the module.  N=200 with max_tile=128 gives
    # a 2x2 tile grid so the multi-tile kj accumulation + padded-row paths are
    # actually exercised.
    N, nfeat, nhid, nclass, nheads = 200, 32, 8, 4, 2
    alpha = 0.2  # dropout unused at inference (identity)

    key = jax.random.PRNGKey(0)
    k_x, k_adj, k_wh, k_ah, k_wo, k_ao = jax.random.split(key, 6)

    x = jax.random.normal(k_x, (N, nfeat), dtype=jnp.float32)

    # Deterministic sparse-ish adjacency with self loops (nonzero == edge).
    adj = (jax.random.uniform(k_adj, (N, N)) < 0.3).astype(jnp.float32)
    adj = jnp.maximum(adj, jnp.eye(N, dtype=jnp.float32))

    # Deterministic xavier-normal-like parameter init (shapes from __init__):
    #   per-head W: (nfeat, nhid), per-head a: (1, 2*nhid) -> stored as (2, nhid)
    #   out W: (nhid*nheads, nclass), out a: (1, 2*nclass) -> stored as (2, nclass)
    def xavier(k, shape, fan_in, fan_out):
        std = (2.0 / (fan_in + fan_out)) ** 0.5
        return std * jax.random.normal(k, shape, dtype=jnp.float32)

    W_heads = xavier(k_wh, (nheads, nfeat, nhid), nfeat, nhid)
    a_heads = xavier(k_ah, (nheads, 2, nhid), 1, 2 * nhid)
    W_out = xavier(k_wo, (nhid * nheads, nclass), nhid * nheads, nclass)
    a_out = xavier(k_ao, (2, nclass), 1, 2 * nclass)

    out = spgat_forward(x, adj, W_heads, a_heads, W_out, a_out, alpha=alpha,
                        max_tile=128)
    out = jax.block_until_ready(out)

    assert out.shape == (N, nclass)
    # rows of log_softmax must exp-sum to ~1
    assert jnp.allclose(jnp.exp(out).sum(axis=1), 1.0, atol=1e-4)
    # matches the f32 dense reference (loose atol: bf16 MXU aggregation)
    ref = _reference_forward(x, adj, W_heads, a_heads, W_out, a_out, alpha)
    assert jnp.allclose(out, ref, atol=5e-2), float(jnp.max(jnp.abs(out - ref)))
    print("KERNEL_OK")
</pallas_src>

<mosaic_0001>
module attributes {stable_mosaic.version = 11 : i64} {
  func.func @_heads_attn_kernel(%arg0: i32, %arg1: i32, %arg2: memref<2x1x128xf32, #tpu.memory_space<vmem>>, %arg3: memref<2x128x1xf32, #tpu.memory_space<vmem>>, %arg4: memref<2x9x128xbf16, #tpu.memory_space<vmem>>, %arg5: memref<128x128xi8, #tpu.memory_space<vmem>>, %arg6: memref<2x8x128xf32, #tpu.memory_space<vmem>>, %arg7: memref<2x9x128xf32, #tpu.memory_space<vmem>>) attributes {dimension_semantics = [#tpu.dimension_semantics<parallel>, #tpu.dimension_semantics<arbitrary>], iteration_bounds = array<i64: 2, 2>, scalar_prefetch = 0 : i64, scratch_operands = 1 : i64, tpu.core_type = #tpu.core_type<tc>, window_params = [{transform_indices = @transform_0, window_bounds = array<i64: 2, 1, 128>}, {transform_indices = @transform_1, window_bounds = array<i64: 2, 128, 1>}, {transform_indices = @transform_2, window_bounds = array<i64: 2, 9, 128>}, {transform_indices = @transform_3, window_bounds = array<i64: 128, 128>}, {transform_indices = @transform_4, window_bounds = array<i64: 2, 8, 128>}]} {
    %c0_i32 = arith.constant 0 : i32
    %0 = arith.cmpi eq, %arg1, %c0_i32 : i32
    %1 = arith.extui %0 : i1 to i32
    %c0_i32_0 = arith.constant 0 : i32
    %2 = arith.cmpi ne, %1, %c0_i32_0 : i32
    scf.if %2 {
      %cst_39 = arith.constant 0.000000e+00 : f32
      %59 = vector.broadcast %cst_39 : f32 to vector<2x9x128xf32>
      %c0_40 = arith.constant 0 : index
      %c0_41 = arith.constant 0 : index
      %c0_42 = arith.constant 0 : index
      %60 = vector.load %arg7[%c0_40, %c0_41, %c0_42] : memref<2x9x128xf32, #tpu.memory_space<vmem>>, vector<2x9x128xf32>
      tpu.vector_store %arg7[%c0_40, %c0_41, %c0_42], %59 {strides = array<i32>} : memref<2x9x128xf32, #tpu.memory_space<vmem>>, vector<2x9x128xf32>,
    } else {
    }
    %c0 = arith.constant 0 : index
    %c0_1 = arith.constant 0 : index
    %3 = vector.load %arg5[%c0, %c0_1] : memref<128x128xi8, #tpu.memory_space<vmem>>, vector<128x128xi8>
    %c0_i8 = arith.constant 0 : i8
    %4 = vector.broadcast %c0_i8 : i8 to vector<128x128xi8>
    %5 = arith.cmpi ne, %3, %4 : vector<128x128xi8>
    %c0_2 = arith.constant 0 : index
    %c0_3 = arith.constant 0 : index
    %c0_4 = arith.constant 0 : index
    %6 = vector.load %arg2[%c0_2, %c0_3, %c0_4] : memref<2x1x128xf32, #tpu.memory_space<vmem>>, vector<1x1x128xf32>
    %7 = vector.shape_cast %6 : vector<1x1x128xf32> to vector<1x128xf32>
    %c0_5 = arith.constant 0 : index
    %c0_6 = arith.constant 0 : index
    %c0_7 = arith.constant 0 : index
    %8 = vector.load %arg3[%c0_5, %c0_6, %c0_7] : memref<2x128x1xf32, #tpu.memory_space<vmem>>, vector<1x128x1xf32>
    %9 = vector.shape_cast %8 : vector<1x128x1xf32> to vector<128x1xf32>
    %10 = vector.broadcast %9 : vector<128x1xf32> to vector<128x128xf32>
    %11 = vector.broadcast %7 : vector<1x128xf32> to vector<128x128xf32>
    %12 = arith.addf %10, %11 : vector<128x128xf32>
    %cst = arith.constant 2.000000e-01 : f32
    %13 = vector.broadcast %cst : f32 to vector<128x128xf32>
    %14 = arith.mulf %13, %12 : vector<128x128xf32>
    %15 = arith.maximumf %12, %14 : vector<128x128xf32>
    %cst_8 = arith.constant 0.000000e+00 : f32
    %16 = vector.broadcast %cst_8 : f32 to vector<128x128xf32>
    %17 = arith.subf %16, %15 : vector<128x128xf32>
    %18 = math.exp %17 : vector<128x128xf32>
    %cst_9 = arith.constant 0.000000e+00 : f32
    %19 = vector.broadcast %cst_9 : f32 to vector<128x128xf32>
    %20 = arith.select %5, %18, %19 : vector<128x128xi1>, vector<128x128xf32>
    %c0_10 = arith.constant 0 : index
    %c0_11 = arith.constant 0 : index
    %c0_12 = arith.constant 0 : index
    %21 = vector.load %arg7[%c0_10, %c0_11, %c0_12] : memref<2x9x128xf32, #tpu.memory_space<vmem>>, vector<1x9x128xf32>
    %22 = vector.shape_cast %21 : vector<1x9x128xf32> to vector<9x128xf32>
    %c0_13 = arith.constant 0 : index
    %c0_14 = arith.constant 0 : index
    %c0_15 = arith.constant 0 : index
    %23 = vector.load %arg4[%c0_13, %c0_14, %c0_15] : memref<2x9x128xbf16, #tpu.memory_space<vmem>>, vector<1x9x128xbf16>
    %24 = vector.shape_cast %23 : vector<1x9x128xbf16> to vector<9x128xbf16>
    %25 = arith.truncf %20 : vector<128x128xf32> to vector<128x128xbf16>
    %cst_16 = arith.constant dense<0.000000e+00> : vector<9x128xf32>
    %26 = tpu.matmul %24, %25, %cst_16 {dimension_numbers = #tpu.dot_dimension_numbers<[1], [0], [0], [1], [0, 0, 1, 1], [], []>} : vector<9x128xbf16>, vector<128x128xbf16>, vector<9x128xf32> -> vector<9x128xf32>
    %27 = arith.addf %22, %26 : vector<9x128xf32>
    %c0_17 = arith.constant 0 : index
    %c0_18 = arith.constant 0 : index
    %c0_19 = arith.constant 0 : index
    %28 = vector.load %arg7[%c0_17, %c0_18, %c0_19] : memref<2x9x128xf32, #tpu.memory_space<vmem>>, vector<1x9x128xf32>
    %29 = vector.shape_cast %28 : vector<1x9x128xf32> to vector<9x128xf32>
    %30 = vector.shape_cast %27 : vector<9x128xf32> to vector<1x9x128xf32>
    tpu.vector_store %arg7[%c0_17, %c0_18, %c0_19], %30 {strides = array<i32>} : memref<2x9x128xf32, #tpu.memory_space<vmem>>, vector<1x9x128xf32>,
    %c1 = arith.constant 1 : index
    %c0_20 = arith.constant 0 : index
    %c0_21 = arith.constant 0 : index
    %31 = vector.load %arg2[%c1, %c0_20, %c0_21] : memref<2x1x128xf32, #tpu.memory_space<vmem>>, vector<1x1x128xf32>
    %32 = vector.shape_cast %31 : vector<1x1x128xf32> to vector<1x128xf32>
    %c1_22 = arith.constant 1 : index
    %c0_23 = arith.constant 0 : index
    %c0_24 = arith.constant 0 : index
    %33 = vector.load %arg3[%c1_22, %c0_23, %c0_24] : memref<2x128x1xf32, #tpu.memory_space<vmem>>, vector<1x128x1xf32>
    %34 = vector.shape_cast %33 : vector<1x128x1xf32> to vector<128x1xf32>
    %35 = vector.broadcast %34 : vector<128x1xf32> to vector<128x128xf32>
    %36 = vector.broadcast %32 : vector<1x128xf32> to vector<128x128xf32>
    %37 = arith.addf %35, %36 : vector<128x128xf32>
    %cst_25 = arith.constant 2.000000e-01 : f32
    %38 = vector.broadcast %cst_25 : f32 to vector<128x128xf32>
    %39 = arith.mulf %38, %37 : vector<128x128xf32>
    %40 = arith.maximumf %37, %39 : vector<128x128xf32>
    %cst_26 = arith.constant 0.000000e+00 : f32
    %41 = vector.broadcast %cst_26 : f32 to vector<128x128xf32>
    %42 = arith.subf %41, %40 : vector<128x128xf32>
    %43 = math.exp %42 : vector<128x128xf32>
    %cst_27 = arith.constant 0.000000e+00 : f32
    %44 = vector.broadcast %cst_27 : f32 to vector<128x128xf32>
    %45 = arith.select %5, %43, %44 : vector<128x128xi1>, vector<128x128xf32>
    %c1_28 = arith.constant 1 : index
    %c0_29 = arith.constant 0 : index
    %c0_30 = arith.constant 0 : index
    %46 = vector.load %arg7[%c1_28, %c0_29, %c0_30] : memref<2x9x128xf32, #tpu.memory_space<vmem>>, vector<1x9x128xf32>
    %47 = vector.shape_cast %46 : vector<1x9x128xf32> to vector<9x128xf32>
    %c1_31 = arith.constant 1 : index
    %c0_32 = arith.constant 0 : index
    %c0_33 = arith.constant 0 : index
    %48 = vector.load %arg4[%c1_31, %c0_32, %c0_33] : memref<2x9x128xbf16, #tpu.memory_space<vmem>>, vector<1x9x128xbf16>
    %49 = vector.shape_cast %48 : vector<1x9x128xbf16> to vector<9x128xbf16>
    %50 = arith.truncf %45 : vector<128x128xf32> to vector<128x128xbf16>
    %cst_34 = arith.constant dense<0.000000e+00> : vector<9x128xf32>
    %51 = tpu.matmul %49, %50, %cst_34 {dimension_numbers = #tpu.dot_dimension_numbers<[1], [0], [0], [1], [0, 0, 1, 1], [], []>} : vector<9x128xbf16>, vector<128x128xbf16>, vector<9x128xf32> -> vector<9x128xf32>
    %52 = arith.addf %47, %51 : vector<9x128xf32>
    %c1_35 = arith.constant 1 : index
    %c0_36 = arith.constant 0 : index
    %c0_37 = arith.constant 0 : index
    %53 = vector.load %arg7[%c1_35, %c0_36, %c0_37] : memref<2x9x128xf32, #tpu.memory_space<vmem>>, vector<1x9x128xf32>
    %54 = vector.shape_cast %53 : vector<1x9x128xf32> to vector<9x128xf32>
    %55 = vector.shape_cast %52 : vector<9x128xf32> to vector<1x9x128xf32>
    tpu.vector_store %arg7[%c1_35, %c0_36, %c0_37], %55 {strides = array<i32>} : memref<2x9x128xf32, #tpu.memory_space<vmem>>, vector<1x9x128xf32>,
    %c1_i32 = arith.constant 1 : i32
    %56 = arith.cmpi eq, %arg1, %c1_i32 : i32
    %57 = arith.extui %56 : i1 to i32
    %c0_i32_38 = arith.constant 0 : i32
    %58 = arith.cmpi ne, %57, %c0_i32_38 : i32
    scf.if %58 {
      %c0_39 = arith.constant 0 : index
      %c0_40 = arith.constant 0 : index
      %c0_41 = arith.constant 0 : index
      %59 = vector.load %arg7[%c0_39, %c0_40, %c0_41] : memref<2x9x128xf32, #tpu.memory_space<vmem>>, vector<2x9x128xf32>
      %60 = vector.extract_strided_slice %59 {offsets = [0, 8, 0], sizes = [2, 1, 128], strides = [1, 1, 1]} : vector<2x9x128xf32> to vector<2x1x128xf32>
      %cst_42 = arith.constant 0.000000e+00 : f32
      %61 = vector.broadcast %cst_42 : f32 to vector<2x1x128xf32>
      %62 = arith.cmpf oeq, %60, %61 : vector<2x1x128xf32>
      %cst_43 = arith.constant 1.000000e+00 : f32
      %63 = vector.broadcast %cst_43 : f32 to vector<2x1x128xf32>
      %64 = arith.select %62, %63, %60 : vector<2x1x128xi1>, vector<2x1x128xf32>
      %65 = vector.extract_strided_slice %59 {offsets = [0, 0, 0], sizes = [2, 8, 128], strides = [1, 1, 1]} : vector<2x9x128xf32> to vector<2x8x128xf32>
      %66 = vector.broadcast %64 : vector<2x1x128xf32> to vector<2x8x128xf32>
      %67 = arith.divf %65, %66 : vector<2x8x128xf32>
      %cst_44 = arith.constant 0.000000e+00 : f32
      %68 = vector.broadcast %cst_44 : f32 to vector<2x8x128xf32>
      %69 = arith.cmpf ogt, %67, %68 : vector<2x8x128xf32>
      %70 = math.exp %67 : vector<2x8x128xf32>
      %cst_45 = arith.constant 1.000000e+00 : f32
      %71 = vector.broadcast %cst_45 : f32 to vector<2x8x128xf32>
      %72 = arith.subf %70, %71 : vector<2x8x128xf32>
      %73 = arith.select %69, %67, %72 : vector<2x8x128xi1>, vector<2x8x128xf32>
      %c0_46 = arith.constant 0 : index
      %c0_47 = arith.constant 0 : index
      %c0_48 = arith.constant 0 : index
      %74 = vector.load %arg6[%c0_46, %c0_47, %c0_48] : memref<2x8x128xf32, #tpu.memory_space<vmem>>, vector<2x8x128xf32>
      tpu.vector_store %arg6[%c0_46, %c0_47, %c0_48], %73 {strides = array<i32>} : memref<2x8x128xf32, #tpu.memory_space<vmem>>, vector<2x8x128xf32>,
    } else {
    }
    return
  }
  func.func @transform_0(%arg0: i32, %arg1: i32) -> (i32, i32, i32) {
    %c0_i32 = arith.constant 0 : i32
    %c0_i32_0 = arith.constant 0 : i32
    %c0_i32_1 = arith.constant 0 : i32
    return %c0_i32, %c0_i32_0, %arg0 : i32, i32, i32
  }
  func.func @transform_1(%arg0: i32, %arg1: i32) -> (i32, i32, i32) {
    %c0_i32 = arith.constant 0 : i32
    %c0_i32_0 = arith.constant 0 : i32
    %c0_i32_1 = arith.constant 0 : i32
    return %c0_i32, %arg1, %c0_i32_0 : i32, i32, i32
  }
  func.func @transform_2(%arg0: i32, %arg1: i32) -> (i32, i32, i32) {
    %c0_i32 = arith.constant 0 : i32
    %c0_i32_0 = arith.constant 0 : i32
    %c0_i32_1 = arith.constant 0 : i32
    return %c0_i32, %c0_i32_0, %arg1 : i32, i32, i32
  }
  func.func @transform_3(%arg0: i32, %arg1: i32) -> (i32, i32) {
    %c0_i32 = arith.constant 0 : i32
    return %arg1, %arg0 : i32, i32
  }
  func.func @transform_4(%arg0: i32, %arg1: i32) -> (i32, i32, i32) {
    %c0_i32 = arith.constant 0 : i32
    %c0_i32_0 = arith.constant 0 : i32
    %c0_i32_1 = arith.constant 0 : i32
    return %c0_i32, %c0_i32_0, %arg0 : i32, i32, i32
  }
}

</mosaic_0001>

<bundles_post_ra>
// kernel: tpu_custom_call.1
= control target key start
LH: loop header
LB: loop body
LE: loop exit
PB: predicated region body
PF: predicated region fallthrough
CT: control target
= control target key end

     0   :  { %9 = vsyncpa [#allocation8], 0  ;;  %s2481_s0 = inlined_call_operand.vmem [shape: f32[2,1,256], index: 0, kind: input, shape index: {}]   ;;  %s2482_s1 = inlined_call_operand.vmem [shape: f32[2,256,1], index: 1, kind: input, shape index: {}]   ;;  %s2483_s2 = inlined_call_operand.vmem [shape: bf16[2,9,256], index: 2, kind: input, shape index: {}]   ;;  %s2484_s3 = inlined_call_operand.vmem [shape: s8[256,256], index: 3, kind: input, shape index: {}]   ;;  %s2485_s4 = inlined_call_operand.hbm [shape: f32[2,8,256], index: 4, kind: output, shape index: {}]  }
   0x1   :  { %11 = vsyncpa [#allocation8 + $0x1], 0  ;;  %s1864_s15 = smov 0   ;;  %s1866_s16 = smov 0  }
   0x2   :  { %s1868_s17 = smov 0   ;;  %s1870_s18 = smov 0  }
   0x3   :  { %s1872_s19 = smov 0   ;;  %s1874_s20 = smov 0  }
   0x4   :  { %s1876_s21 = smov 0   ;;  %s1878_s22 = smov 0  }
   0x5   :  { %s1880_s23 = smov 0   ;;  %s1882_s24 = smov 0  }
   0x6   :  { %s1884_s25 = smov 0   ;;  %s1886_s26 = smov 0  }
   0x7 LB: > { %2489 = sst [smem:[#allocation10_spill]] %s1812_s21  ;;  %s1414_s27 = sadd.s32 4294967295, %s1832_s26   ;;  %s1832_s26 = sphi %s1886_s26, %s17_s26   ;;  %s1828_s25 = sphi %s1884_s25, %s2553_s25   ;;  %s1824_s24 = sphi %s1882_s24, %s2552_s24   ;;  %s1820_s23 = sphi %s1880_s23, %s2551_s23   ;;  %s1816_s22 = sphi %s1878_s22, %s2550_s22   ;;  %s1812_s21 = sphi %s1876_s21, %s2541_s21   ;;  %s1808_s20 = sphi %s1874_s20, %s2549_s20   ;;  %s1804_s19 = sphi %s1872_s19, %s2548_s19   ;;  %s1800_s18 = sphi %s1870_s18, %s2547_s18   ;;  %s1796_s17 = sphi %s1868_s17, %s2546_s17   ;;  %s1792_s16 = sphi %s1866_s16, %s2545_s16   ;;  %s1788_s15 = sphi %s1864_s15, %s2544_s15  }
   0x8   : > { %s1415_s28 = sadd.s32 4294967294, %s1832_s26   ;;  %s26_s29 = sadd.s32 1, %s1824_s24 }
   0x9   : > { %s29_s30 = sadd.s32 1, %s1828_s25  ;;  %p27_p0 = scmp.ge.s32.totalorder %s26_s29, 2 }
   0xa   : > { %s36_s5 = sadd.s32 1, %s1812_s21  ;;  %p43_p1 = scmp.ne.s32.totalorder %s1812_s21, %s1808_s20 }
   0xb   : > { %p44_p2 = scmp.eq.s32.totalorder %s1832_s26, 0  ;;  %s2555_s29 = smov (%p27_p0, %s26_s29), 0 }
   0xc   : > { %2490 = sst [smem:[#allocation11_spill]] %s2555_s29  ;;  %s2557_s30 = smov (!%p27_p0, %s29_s30), %s1828_s25 }
   0xd   : > { %p1940_p3 = por %p44_p2, %p43_p1  ;;  %s59_s7 = ssub.s32 %s1824_s24, %s2555_s29 }
   0xe   : > { %p31_p4 = scmp.ge.s32.totalorder %s2557_s30, 2  ;;  %p60_p5 = scmp.eq.s32.totalorder %s59_s7, 0 }
   0xf   : > { %s62_s8 = sadd.s32 1, %s1804_s19  ;;  %p69_p6 = scmp.ne.s32.totalorder %s1804_s19, %s1800_s18 }
  0x10   : > { %s2559_s30 = smov (%p31_p4, %s2557_s30), 0  ;;  %s116_s13 = sadd.s32 1, %s1796_s17 }
  0x11   : > { %2492 = sst [smem:[#allocation12_spill]] %s2559_s30  ;;  %s33_s10 = ssub.s32 %s1828_s25, %s2559_s30 }
  0x12   : > { %s1952_s9 = scalar_select %p60_p5, %s1804_s19, %s62_s8  }
  0x13   : > { %p1958_p7 = por %p69_p6, %p44_p2  ;;  %p34_p8 = scmp.eq.s32.totalorder %s33_s10, 0 }
  0x14   : > { %2493 = sst [smem:[#allocation13_spill]] %s1952_s9  ;;  %s113_s12 = sor.u32 %s59_s7, %s33_s10 }
  0x15   : > { %p114_p9 = scmp.eq.s32.totalorder %s113_s12, 0  ;;  %p123_p10 = scmp.ne.s32.totalorder %s1796_s17, %s1792_s16 }
  0x16   : > { %s1964_s14 = scalar_select %p34_p8, %s1812_s21, %s36_s5  }
  0x17   : > { %s1967_s29 = scalar_select %p114_p9, %s1796_s17, %s116_s13  }
  0x18   : > { %2495 = sst [smem:[#allocation14_spill]] %s1964_s14  ;;  %p153_p11 = scmp.eq.s32.totalorder %s1414_s27, 3 }
  0x19   : > { %2496 = sst [smem:[#allocation15_spill]] %s1967_s29  ;;  %p158_p12 = scmp.ne.s32.totalorder %s1808_s20, %s1788_s15 }
  0x1a   : > { %p159_p13 = scmp.eq.s32.totalorder %s1415_s28, 3  ;;  %p1975_p0 = por %p123_p10, %p44_p2 }
  0x1b   : > { %p1982_p4 = por %p153_p11, %p43_p1  ;;  %p1417_p6 = scmp.ge.s32.totalorder %s1832_s26, 4 }
  0x1c   : > { %p1986_p5 = por %p159_p13, %p158_p12 }
  0x1d   : > { %175 = sbr.rel (%p1417_p6) target bundleno = 93 (0x5d), region = 16 }
  0x22   : > { %178 = sbr.rel (!%p1940_p3) target bundleno = 39 (0x27), region = 20  ;;  %s180_s27 = sand.u32 (%p1940_p3), 1, %s1812_s21  }
  0x23   : > { %s183_s10 = scalar_lea.vmem (%p1940_p3), %s2481_s0, %s1828_s25  ;;  %s1418_s12 = sshll.u32 (%p1940_p3), %s180_s27, 1 }
  0x24   : > { %v200_v0 = vld [vmem:[%s183_s10] sm:$0x1] (%p1940_p3)  ;;  %v202_v1 = vld [vmem:[%s183_s10 + $0x2] sm:$0x1] (%p1940_p3)  ;;  %s182_s13 = scalar_lea.vmem (%p1940_p3), [#allocation3], %s1418_s12 }
  0x25   : > { %201 = vst [vmem:[%s182_s13] sm:$0x1] (%p1940_p3), %v200_v0 }
  0x26   : > { %203 = vst [vmem:[%s182_s13 + $0x1] sm:$0x1] (%p1940_p3), %v202_v1 }
  0x27 PF: > { %223 = sbr.rel (!%p1958_p7) target bundleno = 75 (0x4b), region = 54  ;;  %s225_s6 = sand.u32 (%p1958_p7), 1, %s1804_s19  }
  0x28   : > { %s1517_s14 = sshll.u32 (%p1958_p7), %s1824_s24, 7  ;;  %s1419_s9 = sshll.u32 (%p1958_p7), %s225_s6, 8 }
  0x29   : > { %s2005_s28 = scalar_lea.vmem (%p1958_p7), %s2482_s1, %s1517_s14  ;;  %s2010_s27 = scalar_lea.vmem (%p1958_p7), [#allocation4], %s1419_s9 }
  0x2a   : > { %v321_v2 = vld [vmem:[%s2005_s28] sm:$0xff] (%p1958_p7)  ;;  %v323_v3 = vld [vmem:[%s2005_s28 + $0x8] sm:$0xff] (%p1958_p7)  ;;  %v325_v4 = vld [vmem:[%s2005_s28 + $0x10] sm:$0xff] (%p1958_p7) }
  0x2b   : > { %322 = vst [vmem:[%s2010_s27] sm:$0xff] (%p1958_p7), %v321_v2  ;;  %v327_v5 = vld [vmem:[%s2005_s28 + $0x18] sm:$0xff] (%p1958_p7)  ;;  %v329_v6 = vld [vmem:[%s2005_s28 + $0x20] sm:$0xff] (%p1958_p7)  ;;  %v331_v7 = vld [vmem:[%s2005_s28 + $0x28] sm:$0xff] (%p1958_p7) }
  0x2c   : > { %324 = vst [vmem:[%s2010_s27 + $0x8] sm:$0xff] %v323_v3  ;;  %v333_v8 = vld [vmem:[%s2005_s28 + $0x30] sm:$0xff]  ;;  %v335_v9 = vld [vmem:[%s2005_s28 + $0x38] sm:$0xff]  ;;  %v337_v10 = vld [vmem:[%s2005_s28 + $0x40] sm:$0xff] }
  0x2d   : > { %326 = vst [vmem:[%s2010_s27 + $0x10] sm:$0xff] %v325_v4  ;;  %v339_v11 = vld [vmem:[%s2005_s28 + $0x48] sm:$0xff]  ;;  %v341_v12 = vld [vmem:[%s2005_s28 + $0x50] sm:$0xff]  ;;  %v343_v13 = vld [vmem:[%s2005_s28 + $0x58] sm:$0xff] }
  0x2e   : > { %328 = vst [vmem:[%s2010_s27 + $0x18] sm:$0xff] %v327_v5  ;;  %v345_v14 = vld [vmem:[%s2005_s28 + $0x60] sm:$0xff]  ;;  %v347_v15 = vld [vmem:[%s2005_s28 + $0x68] sm:$0xff]  ;;  %v349_v16 = vld [vmem:[%s2005_s28 + $0x70] sm:$0xff] }
  0x2f   : > { %330 = vst [vmem:[%s2010_s27 + $0x20] sm:$0xff] %v329_v6  ;;  %v351_v17 = vld [vmem:[%s2005_s28 + $0x78] sm:$0xff]  ;;  %v353_v18 = vld [vmem:[%s2005_s28 + $0x100] sm:$0xff]  ;;  %v355_v19 = vld [vmem:[%s2005_s28 + $0x108] sm:$0xff] }
  0x30   : > { %332 = vst [vmem:[%s2010_s27 + $0x28] sm:$0xff] %v331_v7  ;;  %v357_v20 = vld [vmem:[%s2005_s28 + $0x110] sm:$0xff]  ;;  %v359_v21 = vld [vmem:[%s2005_s28 + $0x118] sm:$0xff]  ;;  %v361_v22 = vld [vmem:[%s2005_s28 + $0x120] sm:$0xff] }
  0x31   : > { %334 = vst [vmem:[%s2010_s27 + $0x30] sm:$0xff] %v333_v8  ;;  %v363_v23 = vld [vmem:[%s2005_s28 + $0x128] sm:$0xff]  ;;  %v365_v24 = vld [vmem:[%s2005_s28 + $0x130] sm:$0xff]  ;;  %v367_v25 = vld [vmem:[%s2005_s28 + $0x138] sm:$0xff] }
  0x32   : > { %336 = vst [vmem:[%s2010_s27 + $0x38] sm:$0xff] %v335_v9  ;;  %v369_v26 = vld [vmem:[%s2005_s28 + $0x140] sm:$0xff]  ;;  %v371_v27 = vld [vmem:[%s2005_s28 + $0x148] sm:$0xff]  ;;  %v373_v28 = vld [vmem:[%s2005_s28 + $0x150] sm:$0xff] }
  0x33   : > { %338 = vst [vmem:[%s2010_s27 + $0x40] sm:$0xff] %v337_v10  ;;  %v375_v29 = vld [vmem:[%s2005_s28 + $0x158] sm:$0xff]  ;;  %v377_v30 = vld [vmem:[%s2005_s28 + $0x160] sm:$0xff]  ;;  %v379_v31 = vld [vmem:[%s2005_s28 + $0x168] sm:$0xff] }
  0x34   : > { %340 = vst [vmem:[%s2010_s27 + $0x48] sm:$0xff] %v339_v11  ;;  %v381_v32 = vld [vmem:[%s2005_s28 + $0x170] sm:$0xff]  ;;  %v383_v33 = vld [vmem:[%s2005_s28 + $0x178] sm:$0xff] }
  0x35   : > { %342 = vst [vmem:[%s2010_s27 + $0x50] sm:$0xff] %v341_v12 }
  0x36   : > { %344 = vst [vmem:[%s2010_s27 + $0x58] sm:$0xff] %v343_v13 }
  0x37   : > { %346 = vst [vmem:[%s2010_s27 + $0x60] sm:$0xff] %v345_v14 }
  0x38   : > { %348 = vst [vmem:[%s2010_s27 + $0x68] sm:$0xff] %v347_v15 }
  0x39   : > { %350 = vst [vmem:[%s2010_s27 + $0x70] sm:$0xff] %v349_v16 }
  0x3a   : > { %352 = vst [vmem:[%s2010_s27 + $0x78] sm:$0xff] %v351_v17 }
  0x3b   : > { %354 = vst [vmem:[%s2010_s27 + $0x80] sm:$0xff] %v353_v18 }
  0x3c   : > { %356 = vst [vmem:[%s2010_s27 + $0x88] sm:$0xff] %v355_v19 }
  0x3d   : > { %358 = vst [vmem:[%s2010_s27 + $0x90] sm:$0xff] %v357_v20 }
  0x3e   : > { %360 = vst [vmem:[%s2010_s27 + $0x98] sm:$0xff] %v359_v21 }
  0x3f   : > { %362 = vst [vmem:[%s2010_s27 + $0xa0] sm:$0xff] %v361_v22 }
  0x40   : > { %364 = vst [vmem:[%s2010_s27 + $0xa8] sm:$0xff] %v363_v23 }
  0x41   : > { %366 = vst [vmem:[%s2010_s27 + $0xb0] sm:$0xff] %v365_v24 }
  0x42   : > { %368 = vst [vmem:[%s2010_s27 + $0xb8] sm:$0xff] %v367_v25 }
  0x43   : > { %370 = vst [vmem:[%s2010_s27 + $0xc0] sm:$0xff] %v369_v26 }
  0x44   : > { %372 = vst [vmem:[%s2010_s27 + $0xc8] sm:$0xff] %v371_v27 }
  0x45   : > { %374 = vst [vmem:[%s2010_s27 + $0xd0] sm:$0xff] %v373_v28 }
  0x46   : > { %376 = vst [vmem:[%s2010_s27 + $0xd8] sm:$0xff] %v375_v29 }
  0x47   : > { %378 = vst [vmem:[%s2010_s27 + $0xe0] sm:$0xff] %v377_v30 }
  0x48   : > { %380 = vst [vmem:[%s2010_s27 + $0xe8] sm:$0xff] %v379_v31 }
  0x49   : > { %382 = vst [vmem:[%s2010_s27 + $0xf0] sm:$0xff] %v381_v32 }
  0x4a   : > { %384 = vst [vmem:[%s2010_s27 + $0xf8] sm:$0xff] %v383_v33 }
  0x4b PF: > { %390 = sbr.rel (!%p1958_p7) target bundleno = 83 (0x53), region = 92  ;;  %s392_s21 = sand.u32 (%p1958_p7), 1, %s1804_s19  }
  0x4c   : > { %s1423_s29 = sshll.u32 (%p1958_p7), %s1824_s24, 2  ;;  %s1422_s9 = sshll.u32 (%p1958_p7), %s392_s21, 4 }
  0x4d   : > { %s396_s10 = scalar_lea.vmem (%p1958_p7), %s2483_s2, %s1423_s29  ;;  %s394_s12 = scalar_lea.vmem (%p1958_p7), [#allocation5], %s1422_s9 }
  0x4e   : > { %v413_v34 = vld [vmem:[%s396_s10] sm:$0xf] (%p1958_p7)  ;;  %v415_v35 = vld [vmem:[%s396_s10 + $0x8] sm:$0xf] (%p1958_p7)  ;;  %v417_v36 = vld [vmem:[%s396_s10 + $0x10] sm:$0xf] (%p1958_p7) }
  0x4f   : > { %414 = vst [vmem:[%s394_s12] sm:$0xf] (%p1958_p7), %v413_v34  ;;  %v419_v37 = vld [vmem:[%s396_s10 + $0x18] sm:$0xf] (%p1958_p7) }
  0x50   : > { %416 = vst [vmem:[%s394_s12 + $0x4] sm:$0xf] %v415_v35 }
  0x51   : > { %418 = vst [vmem:[%s394_s12 + $0x8] sm:$0xf] %v417_v36 }
  0x52   : > { %420 = vst [vmem:[%s394_s12 + $0xc] sm:$0xf] %v419_v37 }
  0x53 PF: > { %452 = sbr.rel (!%p1975_p0) target bundleno = 93 (0x5d), region = 133  ;;  %s454_s11 = sand.u32 (%p1975_p0), 1, %s1796_s17  }
  0x54   : > { %s1518_s13 = sshll.u32 (%p1975_p0), %s1824_s24, 3  ;;  %s1424_s6 = sshll.u32 (%p1975_p0), %s454_s11, 5 }
  0x55   : > { %s459_s28 = sadd.s32 (%p1975_p0), %s1828_s25, %s1518_s13  ;;  %s456_s14 = scalar_lea.vmem (%p1975_p0), [#allocation6], %s1424_s6 }
  0x56   : > { %s1427_s27 = sshll.u32 (%p1975_p0), %s459_s28, 3 }
  0x57   : > { %s461_s9 = scalar_lea.vmem (%p1975_p0), %s2484_s3, %s1427_s27 }
  0x58   : > { %v496_v38 = vld [vmem:[%s461_s9] sm:$0xff]  ;;  %v498_v39 = vld [vmem:[%s461_s9 + $0x10] sm:$0xff] }
  0x59   : > { %v500_v40 = vld [vmem:[%s461_s9 + $0x20] sm:$0xff]  ;;  %497 = vst [vmem:[%s456_s14] sm:$0xff] %v496_v38  ;;  %v502_v41 = vld [vmem:[%s461_s9 + $0x30] sm:$0xff] }
  0x5a   : > { %499 = vst [vmem:[%s456_s14 + $0x8] sm:$0xff] %v498_v39 }
  0x5b   : > { %501 = vst [vmem:[%s456_s14 + $0x10] sm:$0xff] %v500_v40 }
  0x5c   : > { %503 = vst [vmem:[%s456_s14 + $0x18] sm:$0xff] %v502_v41 }
  0x5d PF: > { %p1428_p1 = scmp.ge.s32.totalorder %s1832_s26, 1  ;;  %p508_p2 = scmp.lt.s32.totalorder %s1832_s26, 5 }
  0x5f   : > { %p509_p3 = pnand %p1428_p1, %p508_p2 }
  0x60   : > { %s2091_s8 = sand.u32 (!%p509_p3), 1, %s1808_s20   ;;  %s522_s5 = sand.u32 (!%p509_p3), 1, %s1800_s18  }
  0x61   : > { %512 = sbr.rel (%p509_p3) target bundleno = 532 (0x214), region = 171  ;;  %s1429_s10 = sshll.u32 (!%p509_p3), %s2091_s8, 1 }
  0x62   : > { %s1430_s12 = sshll.u32 (!%p509_p3), %s522_s5, 8  ;;  %s1431_s11 = sshll.u32 (!%p509_p3), %s522_s5, 4 }
  0x63   : > { %s536_s13 = sand.u32 (!%p509_p3), 1, %s1792_s16   ;;  %s1433_s28 = sshll.u32 (!%p509_p3), %s2091_s8, 4 }
  0x64   : > { %s1432_s6 = sshll.u32 (!%p509_p3), %s536_s13, 5  ;;  %s2097_s27 = scalar_lea.vmem (!%p509_p3), [#allocation3], %s1429_s10 }
  0x65   : > { %s2099_s21 = scalar_lea.vmem (!%p509_p3), [#allocation4], %s1430_s12  ;;  %s2101_s29 = scalar_lea.vmem (!%p509_p3), [#allocation5], %s1431_s11 }
  0x66   : > { %s2103_s9 = scalar_lea.vmem [#allocation6], %s1432_s6  ;;  %s2105_s14 = scalar_lea.vmem [#allocation7], %s1433_s28 }
  0x67   : > { %p1434_p7 = scmp.ne.s32.totalorder %s1816_s22, 0 }
  0x69   : > { %580 = sbr.rel (%p1434_p7) target bundleno = 115 (0x73), region = 191 }
  0x6e   : > { %v1834_v42 = vmov 0.0  }
  0x6f   : > { %581 = vst [vmem:[#allocation2 + $0x10] sm:$0xff] %v1834_v42 }
  0x70   : > { %582 = vst [vmem:[#allocation2] sm:$0x1] %v1834_v42 }
  0x71   : > { %583 = vst [vmem:[#allocation2 + $0x18] sm:$0xff] %v1834_v42 }
  0x72   : > { %584 = vst [vmem:[#allocation2 + $0x8] sm:$0x1] %v1834_v42 }
  0x73 PF: > { %v1478_v43 = vld [vmem:[%s2099_s21 + $0xf0] sm:$0xff]  ;;  %v606_v45 = vld [vmem:[%s2099_s21 + $0x60] sm:$0xff]  ;;  %v1835_v46 = vmov 0   ;;  %v1479_v47 = vld [vmem:[%s2099_s21 + $0xf8] sm:$0xff]  ;;  %p1510_p8 = scmp.ne.s32.totalorder %s1816_s22, 1 }
  0x74   : > { %v608_v44 = vld [vmem:[%s2099_s21 + $0x70] sm:$0xff]  ;;  %1631 = vset.pattern.permute.xlu2 %v1835_v46  ;;  %1630 = vset.pattern.permute.xlu1 %v1835_v46  ;;  %v609_v48 = vld [vmem:[%s2099_s21 + $0x78] sm:$0xff]  ;;  %v607_v49 = vld [vmem:[%s2099_s21 + $0x68] sm:$0xff] }
  0x75   : > { %1629 = vset.pattern.permute.xlu0 %v1835_v46  ;;  %1048 = vperm.xlu1 %1630, %v1478_v43   ;;  %v1477_v50 = vld [vmem:[%s2099_s21 + $0xe8] sm:$0xff]  ;;  %v1476_v51 = vld [vmem:[%s2099_s21 + $0xe0] sm:$0xff]  ;;  %v604_v52 = vld [vmem:[%s2099_s21 + $0x50] sm:$0xff] }
  0x76   : > { %682 = vperm.xlu0 %1629, %v608_v44   ;;  %672 = vperm.xlu2 %1631, %v606_v45   ;;  %v1474_v53 = vld [vmem:[%s2099_s21 + $0xd0] sm:$0xff]  ;;  %v605_v54 = vld [vmem:[%s2099_s21 + $0x58] sm:$0xff]  ;;  %v603_v56 = vld [vmem:[%s2099_s21 + $0x48] sm:$0xff] }
  0x77   : > { %v1475_v55 = vld [vmem:[%s2099_s21 + $0xd8] sm:$0xff]  ;;  %v1472_v57 = vld [vmem:[%s2099_s21 + $0xc0] sm:$0xff]  ;;  %v600_v59 = vld [vmem:[%s2099_s21 + $0x30] sm:$0xff] }
  0x78   : > { %v602_v58 = vld [vmem:[%s2099_s21 + $0x40] sm:$0xff]  ;;  %v1473_v60 = vld [vmem:[%s2099_s21 + $0xc8] sm:$0xff]  ;;  %v601_v61 = vld [vmem:[%s2099_s21 + $0x38] sm:$0xff] }
  0x79   : > { %v1471_v62 = vld [vmem:[%s2099_s21 + $0xb8] sm:$0xff]  ;;  %v1470_v63 = vld [vmem:[%s2099_s21 + $0xb0] sm:$0xff]  ;;  %v598_v0 = vld [vmem:[%s2099_s21 + $0x20] sm:$0xff] }
  0x7a   : > { %v1468_v1 = vld [vmem:[%s2099_s21 + $0xa0] sm:$0xff]  ;;  %v599_v2 = vld [vmem:[%s2099_s21 + $0x28] sm:$0xff]  ;;  %v597_v4 = vld [vmem:[%s2099_s21 + $0x18] sm:$0xff] }
  0x7b   : > { %v1469_v3 = vld [vmem:[%s2099_s21 + $0xa8] sm:$0xff]  ;;  %v1466_v5 = vld [vmem:[%s2099_s21 + $0x90] sm:$0xff]  ;;  %v594_v7 = vld [vmem:[%s2099_s21] sm:$0xff] }
  0x7c   : > { %v596_v6 = vld [vmem:[%s2099_s21 + $0x10] sm:$0xff]  ;;  %v1467_v8 = vld [vmem:[%s2099_s21 + $0x98] sm:$0xff]  ;;  %v595_v9 = vld [vmem:[%s2099_s21 + $0x8] sm:$0xff] }
  0x7d   : > { %1053 = vperm.xlu1 %1630, %v1479_v47   ;;  %v1465_v10 = vld [vmem:[%s2099_s21 + $0x88] sm:$0xff]  ;;  %v1464_v11 = vld [vmem:[%s2099_s21 + $0x80] sm:$0xff]  ;;  %v588_v14 = vld [vmem:[%s2103_s9 + $0x18] sm:$0xff] }
  0x7e   : > { %687 = vperm.xlu0 %1629, %v609_v48   ;;  %677 = vperm.xlu2 %1631, %v607_v49   ;;  %v2145_v15 = vld [vmem:[%s2097_s27] ss:$0 sm:$0xff]  ;;  %vm592_vm0 = vnez %v588_v14  ;;  %v2151_v24 = vld [vmem:[%s2097_s27 + $0x1] ss:$0 sm:$0xff]  ;;  %v587_v31 = vld [vmem:[%s2103_s9 + $0x10] sm:$0xff] }
  0x7f   : > { %v792_v17 = vsel %vm592_vm0, 16843009, %v1835_v46  ;;  %vm591_vm1 = vnez %v587_v31 }
  0x80   : > { %v807_v20 = vunpack.c.2.s8 %v792_v17  ;;  %v808_v22 = vunpack.c.3.s8 %v792_v17  ;;  %v805_v25 = vunpack.c.0.s8 %v792_v17  ;;  %v806_v30 = vunpack.c.1.s8 %v792_v17 }
  0x81   : > { %v2157_v49 = vsel %vm591_vm1, 16843009, %v1835_v46 }
  0x82   : > { %v837_v26 = vpack.c.b16 %v807_v20, %v807_v20  ;;  %v839_v29 = vpack.c.b16 %v808_v22, %v808_v22  ;;  %v833_v37 = vpack.c.b16 %v805_v25, %v805_v25  ;;  %v835_v43 = vpack.c.b16 %v806_v30, %v806_v30 }
  0x84   : > { %v838_v39 = vpack.c.b8 %v837_v26, %v837_v26  ;;  %v840_v42 = vpack.c.b8 %v839_v29, %v839_v29  ;;  %v834_v48 = vpack.c.b8 %v833_v37, %v833_v37 }
  0x85   : > { %1043 = vperm.xlu1 %1630, %v1477_v50  }
  0x86   : > { %1038 = vperm.xlu0 %1629, %v1476_v51   ;;  %662 = vperm.xlu2 %1631, %v604_v52   ;;  %vm855_vm2 = vnez %v838_v39  ;;  %vm856_vm3 = vnez %v840_v42  ;;  %vm853_vm4 = vnez %v834_v48 }
  0x8d   : > { %1028 = vperm.xlu1 %1630, %v1474_v53   ;;  %v836_v53 = vpack.c.b8 %v835_v43, %v835_v43 }
  0x8e   : > { %667 = vperm.xlu0 %1629, %v605_v54   ;;  %1033 = vperm.xlu2 %1631, %v1475_v55  }
  0x8f   : > { %vm854_vm5 = vnez %v836_v53  ;;  %v586_v53 = vld [vmem:[%s2103_s9 + $0x8] sm:$0xff] }
  0x90   : > { %vm590_vm13 = vnez %v586_v53 }
  0x95   : > { %657 = vperm.xlu1 %1630, %v603_v56  }
  0x96   : > { %1018 = vperm.xlu2 %1631, %v1472_v57   ;;  %652 = vperm.xlu0 %1629, %v602_v58   ;;  %v803_v58 = vunpack.c.2.s8 %v2157_v49 }
  0x9d   : > { %642 = vperm.xlu1 %1630, %v600_v59  }
  0x9e   : > { %1023 = vperm.xlu0 %1629, %v1473_v60   ;;  %647 = vperm.xlu2 %1631, %v601_v61   ;;  %v871_v61 = vsel %vm855_vm2, 16843009, %v1835_v46 }
  0xa5   : > { %1013 = vperm.xlu1 %1630, %v1471_v62  }
  0xa6   : > { %1008 = vperm.xlu0 %1629, %v1470_v63   ;;  %632 = vperm.xlu2 %1631, %v598_v0  }
  0xad   : > { %998 = vperm.xlu1 %1630, %v1468_v1   ;;  %v872_v1 = vsel %vm856_vm3, 16843009, %v1835_v46 }
  0xae   : > { %637 = vperm.xlu0 %1629, %v599_v2   ;;  %1003 = vperm.xlu2 %1631, %v1469_v3  }
  0xb5   : > { %627 = vperm.xlu1 %1630, %v597_v4   ;;  %v804_v4 = vunpack.c.3.s8 %v2157_v49 }
  0xb6   : > { %988 = vperm.xlu2 %1631, %v1466_v5   ;;  %622 = vperm.xlu0 %1629, %v596_v6  }
  0xb7   : > { %v831_v22 = vpack.c.b16 %v804_v4, %v804_v4 }
  0xb9   : > { %v832_v37 = vpack.c.b8 %v831_v22, %v831_v22 }
  0xbb   : > { %vm2202_vm11 = vnez %v832_v37 }
  0xbd   : > { %612 = vperm.xlu1 %1630, %v594_v7   ;;  %v869_v7 = vsel %vm853_vm4, 16843009, %v1835_v46 }
  0xbe   : > { %993 = vperm.xlu0 %1629, %v1467_v8   ;;  %617 = vperm.xlu2 %1631, %v595_v9   ;;  %v829_v8 = vpack.c.b16 %v803_v58, %v803_v58 }
  0xc5   : > { %983 = vperm.xlu1 %1630, %v1465_v10  }
  0xc6   : > { %978 = vperm.xlu0 %1629, %v1464_v11   ;;  %v887_v11 = vunpack.c.0.s8 %v871_v61 }
  0xc8   : > { %vm2184_vm7 = vcmp.ne.s32.totalorder %v887_v11, 0 }
  0xd0   : > { %v673_v12 = vpop.permute.xlu2 %672 }
  0xd1   : > { %v705_v16 = vadd.f32 %v2145_v15, %v673_v12  ;;  %v888_v12 = vunpack.c.0.s8 %v872_v1 }
  0xd3   : > { %v721_v18 = vmul.f32 0.2, %v705_v16  ;;  %vm2188_vm8 = vcmp.ne.s32.totalorder %v888_v12, 0  ;;  %v868_v12 = vsel %vm2202_vm11, 16843009, %v1835_v46 }
  0xd4   : > { %vm1439_vm12 = vmpackc.low %vm2188_vm8, %vm2184_vm7 }
  0xd5   : > { %v737_v23 = vmax.f32 %v705_v16, %v721_v18  ;;  %v870_v18 = vsel %vm854_vm5, 16843009, %v1835_v46 }
  0xd6   : > { %v886_v31 = vunpack.c.0.s8 %v870_v18  ;;  %v2223_v18 = vsel %vm590_vm13, 16843009, %v1835_v46 }
  0xd7   : > { %v753_v32 = vsub.f32 0.0, %v737_v23 }
  0xd8   : > { %v678_v13 = vpop.permute.xlu2 %677  ;;  %vm2196_vm10 = vcmp.ne.s32.totalorder %v886_v31, 0 }
  0xd9   : > { %v706_v21 = vadd.f32 %v2145_v15, %v678_v13  ;;  %v781_v44 = vmul.f32 1.442695, %v753_v32 }
  0xdb   : > { %v722_v27 = vmul.f32 0.2, %v706_v21  ;;  %1634 = vpow2.f32 %v781_v44 }
  0xdd   : > { %v738_v40 = vmax.f32 %v706_v21, %v722_v27  ;;  %v885_v21 = vunpack.c.0.s8 %v869_v7  ;;  %v830_v27 = vpack.c.b8 %v829_v8, %v829_v8 }
  0xdf   : > { %v754_v51 = vsub.f32 0.0, %v738_v40  ;;  %vm2176_vm6 = vnez %v830_v27  ;;  %v801_v40 = vunpack.c.0.s8 %v2157_v49  ;;  %vm2192_vm9 = vcmp.ne.s32.totalorder %v885_v21, 0 }
  0xe0   : > { %v663_v19 = vpop.permute.xlu2 %662  ;;  %vm1442_vm14 = vmpackc.low %vm2196_vm10, %vm2192_vm9 }
  0xe1   : > { %v703_v50 = vadd.f32 %v2145_v15, %v663_v19  ;;  %v783_v2 = vmul.f32 1.442695, %v754_v51  ;;  %v2168_v13 = vpop.eup %1634 }
  0xe3   : > { %v719_v62 = vmul.f32 0.2, %v703_v50  ;;  %1636 = vpow2.f32 %v783_v2 }
  0xe5   : > { %v735_v14 = vmax.f32 %v703_v50, %v719_v62 }
  0xe7   : > { %v1049_v28 = vpop.permute.xlu1 %1048  ;;  %v751_v32 = vsub.f32 0.0, %v735_v14 }
  0xe8   : > { %v1073_v33 = vadd.f32 %v2151_v24, %v1049_v28  ;;  %v683_v34 = vpop.permute.xlu0 %682  ;;  %v1034_v35 = vpop.permute.xlu2 %1033 }
  0xe9   : > { %v707_v36 = vadd.f32 %v2145_v15, %v683_v34  ;;  %v1070_v63 = vadd.f32 %v2151_v24, %v1034_v35  ;;  %v2182_v42 = vpop.eup %1636  ;;  %v777_v50 = vmul.f32 1.442695, %v751_v32 }
  0xea   : > { %v1089_v38 = vmul.f32 0.2, %v1073_v33  ;;  %v1443_v21 = vpack.c.bf16 %v2182_v42, %v2168_v13 }
  0xeb   : > { %v723_v41 = vmul.f32 0.2, %v707_v36  ;;  %v1086_v16 = vmul.f32 0.2, %v1070_v63 }
  0xec   : > { %v1105_v45 = vmax.f32 %v1073_v33, %v1089_v38 }
  0xed   : > { %v739_v47 = vmax.f32 %v707_v36, %v723_v41  ;;  %v1102_v33 = vmax.f32 %v1070_v63, %v1086_v16  ;;  %v802_v41 = vunpack.c.1.s8 %v2157_v49 }
  0xee   : > { %v1121_v54 = vsub.f32 0.0, %v1105_v45 }
  0xef   : > { %v1054_v52 = vpop.permute.xlu1 %1053  ;;  %v755_v59 = vsub.f32 0.0, %v739_v47  ;;  %v1118_v51 = vsub.f32 0.0, %v1102_v33  ;;  %v827_v1 = vpack.c.b16 %v802_v41, %v802_v41 }
  0xf0   : > { %v1074_v55 = vadd.f32 %v2151_v24, %v1054_v52  ;;  %v688_v56 = vpop.permute.xlu0 %687  ;;  %v1019_v57 = vpop.permute.xlu2 %1018  ;;  %v1151_v5 = vmul.f32 1.442695, %v1121_v54 }
  0xf1   : > { %v708_v60 = vadd.f32 %v2145_v15, %v688_v56  ;;  %v785_v9 = vmul.f32 1.442695, %v755_v59  ;;  %v2174_v35 = vadd.f32 %v2151_v24, %v1019_v57  ;;  %v2209_v59 = vsel %vm2176_vm6, 16843009, %v1835_v46 }
  0xf2   : > { %v1090_v0 = vmul.f32 0.2, %v1074_v55  ;;  %1638 = vpow2.f32 %v1151_v5 }
  0xf3   : > { %v724_v3 = vmul.f32 0.2, %v708_v60  ;;  %1640 = vpow2.f32 %v785_v9  ;;  %v1145_v9 = vmul.f32 1.442695, %v1118_v51 }
  0xf4   : > { %v1106_v6 = vmax.f32 %v1074_v55, %v1090_v0  ;;  %v1083_v55 = vmul.f32 0.2, %v2174_v35  ;;  %v825_v0 = vpack.c.b16 %v801_v40, %v801_v40 }
  0xf5   : > { %v740_v10 = vmax.f32 %v708_v60, %v724_v3 }
  0xf6   : > { %v1122_v17 = vsub.f32 0.0, %v1106_v6  ;;  %v1099_v14 = vmax.f32 %v2174_v35, %v1083_v55 }
  0xf7   : > { %v756_v19 = vsub.f32 0.0, %v740_v10  ;;  %v1044_v20 = vpop.permute.xlu1 %1043 }
  0xf8   : > { %v1153_v23 = vmul.f32 1.442695, %v1122_v17  ;;  %v1072_v25 = vadd.f32 %v2151_v24, %v1044_v20  ;;  %v1039_v26 = vpop.permute.xlu0 %1038  ;;  %v648_v30 = vpop.permute.xlu2 %647  ;;  %v826_v17 = vpack.c.b8 %v825_v0, %v825_v0  ;;  %v1115_v32 = vsub.f32 0.0, %v1099_v14 }
  0xf9   : > { %v787_v28 = vmul.f32 1.442695, %v756_v19  ;;  %v1071_v29 = vadd.f32 %v2151_v24, %v1039_v26  ;;  %v1639_v48 = vpop.eup %1638  ;;  %v700_v4 = vadd.f32 %v2145_v15, %v648_v30  ;;  %v828_v26 = vpack.c.b8 %v827_v1, %v827_v1 }
  0xfa   : > { %1642 = vpow2.f32 %v1153_v23  ;;  %v1088_v34 = vmul.f32 0.2, %v1072_v25  ;;  %v1641_v54 = vpop.eup %1640  ;;  %v883_v23 = vunpack.c.0.s8 %v2209_v59  ;;  %v800_v30 = vunpack.c.3.s8 %v2223_v18 }
  0xfb   : > { %1644 = vpow2.f32 %v787_v28  ;;  %v1087_v36 = vmul.f32 0.2, %v1071_v29  ;;  %v716_v19 = vmul.f32 0.2, %v700_v4  ;;  %vm2240_vm15 = vnez %v826_v17 }
  0xfc   : > { %v1104_v38 = vmax.f32 %v1072_v25, %v1088_v34  ;;  %v884_v25 = vunpack.c.0.s8 %v868_v12  ;;  %vm850_vm0 = vnez %v828_v26  ;;  %v865_v51 = vsel %vm2240_vm15, 16843009, %v1835_v46 }
  0xfd   : > { %v1103_v43 = vmax.f32 %v1071_v29, %v1087_v36  ;;  %v799_v29 = vunpack.c.2.s8 %v2223_v18  ;;  %v732_v37 = vmax.f32 %v700_v4, %v716_v19  ;;  %v1139_v58 = vmul.f32 1.442695, %v1115_v32 }
  0xfe   : > { %v1120_v52 = vsub.f32 0.0, %v1104_v38  ;;  %vm2258_vm1 = vcmp.ne.s32.totalorder %v883_v23, 0  ;;  %vm2262_vm2 = vcmp.ne.s32.totalorder %v884_v25, 0  ;;  %v585_v25 = vld [vmem:[%s2103_s9] sm:$0xff] }
  0xff   : > { %v1119_v56 = vsub.f32 0.0, %v1103_v43  ;;  %v1029_v57 = vpop.permute.xlu1 %1028  ;;  %v821_v45 = vpack.c.b16 %v799_v29, %v799_v29  ;;  %v748_v53 = vsub.f32 0.0, %v732_v37  ;;  %vm1445_vm3 = vmpackc.low %vm2262_vm2, %vm2258_vm1  ;;  %v797_v29 = vunpack.c.0.s8 %v2223_v18 }
 0x100   : > { %v1643_v60 = vpop.eup %1642  ;;  %v1149_v61 = vmul.f32 1.442695, %v1120_v52  ;;  %v1069_v62 = vadd.f32 %v2151_v24, %v1029_v57  ;;  %v668_v63 = vpop.permute.xlu0 %667  ;;  %v866_v57 = vsel %vm850_vm0, 16843009, %v1835_v46  ;;  %vm589_vm8 = vnez %v585_v25 }
 0x101   : > { %v1645_v2 = vpop.eup %1644  ;;  %v1147_v3 = vmul.f32 1.442695, %v1119_v56  ;;  %v704_v5 = vadd.f32 %v2145_v15, %v668_v63  ;;  %v1487_v8 = vpack.c.bf16 %v1643_v60, %v1639_v48  ;;  %v633_v11 = vpop.permute.xlu2 %632  ;;  %v823_v48 = vpack.c.b16 %v800_v30, %v800_v30 }
 0x102   : > { %1646 = vpow2.f32 %v1149_v61  ;;  %v1085_v6 = vmul.f32 0.2, %v1069_v62  ;;  %v1440_v7 = vpack.c.bf16 %v1645_v2, %v1641_v54  ;;  %v2245_v39 = vadd.f32 %v2145_v15, %v633_v11 }
 0x103   : > { %1648 = vpow2.f32 %v1147_v3  ;;  %v720_v10 = vmul.f32 0.2, %v704_v5  ;;  %1488 = vmatpush.bf16.msk.msra.mxu1 %vm1439_vm12, %v1487_v8  ;;  %v822_v63 = vpack.c.b8 %v821_v45, %v821_v45  ;;  %v824_v0 = vpack.c.b8 %v823_v48, %v823_v48 }
 0x104   : > { %v1101_v16 = vmax.f32 %v1069_v62, %v1085_v6  ;;  %1441 = vmatpush.bf16.msk.msra.mxu0 %vm1439_vm12, %v1440_v7  ;;  %1650 = vpow2.f32 %v777_v50  ;;  %v713_v54 = vmul.f32 0.2, %v2245_v39  ;;  %v881_v62 = vunpack.c.0.s8 %v865_v51 }
 0x105   : > { %v736_v20 = vmax.f32 %v704_v5, %v720_v10  ;;  %1652 = vpow2.f32 %v1145_v9  ;;  %v882_v6 = vunpack.c.0.s8 %v866_v57  ;;  %v771_v8 = vmul.f32 1.442695, %v748_v53 }
 0x106   : > { %v1117_v22 = vsub.f32 0.0, %v1101_v16  ;;  %v729_v9 = vmax.f32 %v2245_v39, %v713_v54  ;;  %vm847_vm4 = vnez %v822_v63  ;;  %vm848_vm5 = vnez %v824_v0 }
 0x107   : > { %v752_v27 = vsub.f32 0.0, %v736_v20  ;;  %v658_v28 = vpop.permute.xlu1 %657  ;;  %vm2274_vm6 = vcmp.ne.s32.totalorder %v881_v62, 0  ;;  %vm2278_vm7 = vcmp.ne.s32.totalorder %v882_v6, 0  ;;  %v817_v45 = vpack.c.b16 %v797_v29, %v797_v29 }
 0x108   : > { %v1647_v31 = vpop.eup %1646  ;;  %v1143_v33 = vmul.f32 1.442695, %v1117_v22  ;;  %v702_v34 = vadd.f32 %v2145_v15, %v658_v28  ;;  %v653_v35 = vpop.permute.xlu0 %652  ;;  %1444 = vmatpush.bf16.msk.msra.mxu0 %vm1442_vm14, %v1443_v21  ;;  %v864_v28 = vsel %vm848_vm5, 16843009, %v1835_v46  ;;  %v745_v30 = vsub.f32 0.0, %v729_v9  ;;  %vm1448_vm9 = vmpackc.low %vm2278_vm7, %vm2274_vm6 }
 0x109   : > { %v1649_v36 = vpop.eup %1648  ;;  %v779_v38 = vmul.f32 1.442695, %v752_v27  ;;  %v701_v40 = vadd.f32 %v2145_v15, %v653_v35  ;;  %v1004_v56 = vpop.permute.xlu2 %1003  ;;  %v863_v27 = vsel %vm847_vm4, 16843009, %v1835_v46  ;;  %v818_v63 = vpack.c.b8 %v817_v45, %v817_v45 }
 0x10a   : > { %1654 = vpow2.f32 %v1143_v33  ;;  %v718_v41 = vmul.f32 0.2, %v702_v34  ;;  %v1490_v42 = vpack.c.bf16 %v1647_v31, %v1649_v36  ;;  %v1651_v43 = vpop.eup %1650  ;;  %v1064_v3 = vadd.f32 %v2151_v24, %v1004_v56 }
 0x10b   : > { %1656 = vpow2.f32 %v779_v38  ;;  %v717_v44 = vmul.f32 0.2, %v701_v40  ;;  %v1653_v52 = vpop.eup %1652  ;;  %vm845_vm13 = vnez %v818_v63 }
 0x10c   : > { %v734_v50 = vmax.f32 %v702_v34, %v718_v41  ;;  %1491 = vmatpush.bf16.msk.msra.mxu1 %vm1442_vm14, %v1490_v42  ;;  %v1080_v19 = vmul.f32 0.2, %v1064_v3  ;;  %v798_v34 = vunpack.c.1.s8 %v2223_v18  ;;  %v879_v42 = vunpack.c.0.s8 %v863_v27 }
 0x10d   : > { %v733_v55 = vmax.f32 %v701_v40, %v717_v44 }
 0x10e   : > { %v750_v59 = vsub.f32 0.0, %v734_v50  ;;  %v1096_v13 = vmax.f32 %v1064_v3, %v1080_v19  ;;  %v819_v51 = vpack.c.b16 %v798_v34, %v798_v34  ;;  %vm2304_vm10 = vcmp.ne.s32.totalorder %v879_v42, 0 }
 0x10f   : > { %v749_v60 = vsub.f32 0.0, %v733_v55  ;;  %v643_v61 = vpop.permute.xlu1 %642 }
 0x110   : > { %v1655_v1 = vpop.eup %1654  ;;  %v775_v2 = vmul.f32 1.442695, %v750_v59  ;;  %v1024_v4 = vpop.permute.xlu0 %1023  ;;  %v699_v5 = vadd.f32 %v2145_v15, %v643_v61  ;;  %v1112_v53 = vsub.f32 0.0, %v1096_v13  ;;  %v820_v0 = vpack.c.b8 %v819_v51, %v819_v51 }
 0x111   : > { %v1657_v7 = vpop.eup %1656  ;;  %v773_v10 = vmul.f32 1.442695, %v749_v60  ;;  %v1068_v11 = vadd.f32 %v2151_v24, %v1024_v4  ;;  %v1493_v16 = vpack.c.bf16 %v1653_v52, %v1655_v1  ;;  %v989_v32 = vpop.permute.xlu2 %988  ;;  %v2294_v52 = vsel %vm589_vm8, 16843009, %v1835_v46 }
 0x112   : > { %1658 = vpow2.f32 %v775_v2  ;;  %v715_v12 = vmul.f32 0.2, %v699_v5  ;;  %v1446_v14 = vpack.c.bf16 %v1657_v7, %v1651_v43  ;;  %v880_v43 = vunpack.c.0.s8 %v864_v28 }
 0x113   : > { %1660 = vpow2.f32 %v773_v10  ;;  %v1084_v17 = vmul.f32 0.2, %v1068_v11  ;;  %1494 = vmatpush.bf16.msk.msra.mxu1 %vm1445_vm3, %v1493_v16  ;;  %v2302_v56 = vadd.f32 %v2151_v24, %v989_v32  ;;  %v795_v47 = vunpack.c.2.s8 %v2294_v52 }
 0x114   : > { %v731_v20 = vmax.f32 %v699_v5, %v715_v12  ;;  %1447 = vmatpush.bf16.msk.msra.mxu0 %vm1445_vm3, %v1446_v14  ;;  %1662 = vpow2.f32 %v1139_v58  ;;  %vm2308_vm11 = vcmp.ne.s32.totalorder %v880_v43, 0  ;;  %v765_v60 = vmul.f32 1.442695, %v745_v30 }
 0x115   : > { %v1100_v21 = vmax.f32 %v1068_v11, %v1084_v17  ;;  %1664 = vpow2.f32 %v771_v8  ;;  %v1133_v2 = vmul.f32 1.442695, %v1112_v53  ;;  %vm1451_vm12 = vmpackc.low %vm2308_vm11, %vm2304_vm10  ;;  %v796_v6 = vunpack.c.3.s8 %v2294_v52 }
 0x116   : > { %v747_v26 = vsub.f32 0.0, %v731_v20  ;;  %v1077_v8 = vmul.f32 0.2, %v2302_v56  ;;  %v813_v17 = vpack.c.b16 %v795_v47, %v795_v47  ;;  %vm846_vm14 = vnez %v820_v0 }
 0x117   : > { %v1116_v31 = vsub.f32 0.0, %v1100_v21  ;;  %v1014_v33 = vpop.permute.xlu1 %1013  ;;  %v815_v25 = vpack.c.b16 %v796_v6, %v796_v6  ;;  %v861_v28 = vsel %vm845_vm13, 16843009, %v1835_v46  ;;  %v862_v29 = vsel %vm846_vm14, 16843009, %v1835_v46 }
 0x118   : > { %v1659_v35 = vpop.eup %1658  ;;  %v769_v36 = vmul.f32 1.442695, %v747_v26  ;;  %v1009_v37 = vpop.permute.xlu0 %1008  ;;  %v1066_v38 = vadd.f32 %v2151_v24, %v1014_v33  ;;  %v814_v30 = vpack.c.b8 %v813_v17, %v813_v17  ;;  %v793_v34 = vunpack.c.0.s8 %v2294_v52 }
 0x119   : > { %v1661_v39 = vpop.eup %1660  ;;  %v1141_v40 = vmul.f32 1.442695, %v1116_v31  ;;  %v1065_v41 = vadd.f32 %v2151_v24, %v1009_v37  ;;  %v618_v10 = vpop.permute.xlu2 %617  ;;  %v1093_v31 = vmax.f32 %v2302_v56, %v1077_v8  ;;  %v794_v23 = vunpack.c.1.s8 %v2294_v52 }
 0x11a   : > { %1666 = vpow2.f32 %v769_v36  ;;  %v1082_v18 = vmul.f32 0.2, %v1066_v38  ;;  %v1449_v44 = vpack.c.bf16 %v1659_v35, %v1661_v39  ;;  %v1663_v48 = vpop.eup %1662  ;;  %v694_v20 = vadd.f32 %v2145_v15, %v618_v10 }
 0x11b   : > { %1668 = vpow2.f32 %v1141_v40  ;;  %v1081_v50 = vmul.f32 0.2, %v1065_v41  ;;  %v1665_v55 = vpop.eup %1664  ;;  %v877_v42 = vunpack.c.0.s8 %v861_v28  ;;  %v878_v43 = vunpack.c.0.s8 %v862_v29 }
 0x11c   : > { %v1098_v54 = vmax.f32 %v1066_v38, %v1082_v18  ;;  %1450 = vmatpush.bf16.msk.msra.mxu0 %vm1448_vm9, %v1449_v44  ;;  %v710_v35 = vmul.f32 0.2, %v694_v20  ;;  %v816_v38 = vpack.c.b8 %v815_v25, %v815_v25  ;;  %vm843_vm15 = vnez %v814_v30 }
 0x11d   : > { %v1097_v57 = vmax.f32 %v1065_v41, %v1081_v50  ;;  %v809_v51 = vpack.c.b16 %v793_v34, %v793_v34  ;;  %v811_v52 = vpack.c.b16 %v794_v23, %v794_v23  ;;  %v1109_v53 = vsub.f32 0.0, %v1093_v31 }
 0x11e   : > { %v1114_v49 = vsub.f32 0.0, %v1098_v54  ;;  %v726_v54 = vmax.f32 %v694_v20, %v710_v35  ;;  %vm844_vm0 = vnez %v816_v38  ;;  %vm2344_vm1 = vcmp.ne.s32.totalorder %v877_v42, 0 }
 0x11f   : > { %v1113_v61 = vsub.f32 0.0, %v1097_v57  ;;  %v999_v62 = vpop.permute.xlu1 %998  ;;  %vm2348_vm2 = vcmp.ne.s32.totalorder %v878_v43, 0  ;;  %v860_v59 = vsel %vm844_vm0, 16843009, %v1835_v46  ;;  %v810_v58 = vpack.c.b8 %v809_v51, %v809_v51  ;;  %v1484_v57 = vld [vmem:[%s2101_s29 + $0x8] sm:$0xf] }
 0x120   : > { %v1667_v1 = vpop.eup %1666  ;;  %v1137_v3 = vmul.f32 1.442695, %v1114_v49  ;;  %v1063_v4 = vadd.f32 %v2151_v24, %v999_v62  ;;  %v638_v5 = vpop.permute.xlu0 %637  ;;  %v812_v63 = vpack.c.b8 %v811_v52, %v811_v52  ;;  %vm1454_vm3 = vmpackc.low %vm2348_vm2, %vm2344_vm1  ;;  %v1520_v49 = vld [vmem:[%s2101_s29 + $0x8] sm:$0x10] }
 0x121   : > { %v1669_v7 = vpop.eup %1668  ;;  %v1135_v9 = vmul.f32 1.442695, %v1113_v61  ;;  %v698_v11 = vadd.f32 %v2145_v15, %v638_v5  ;;  %v1452_v12 = vpack.c.bf16 %v1665_v55, %v1667_v1  ;;  %v1127_v1 = vmul.f32 1.442695, %v1109_v53 }
 0x122   : > { %1670 = vpow2.f32 %v1137_v3  ;;  %v1079_v14 = vmul.f32 0.2, %v1063_v4  ;;  %v1496_v16 = vpack.c.bf16 %v1669_v7, %v1663_v48  ;;  %vm841_vm4 = vnez %v810_v58 }
 0x123   : > { %1672 = vpow2.f32 %v1135_v9  ;;  %v714_v19 = vmul.f32 0.2, %v698_v11  ;;  %1453 = vmatpush.bf16.msk.msra.mxu0 %vm1451_vm12, %v1452_v12  ;;  %vm842_vm5 = vnez %v812_v63  ;;  %v922_v63 = vld [vmem:[#allocation2] sm:$0x1] }
 0x124   : > { %1674 = vpow2.f32 %v765_v60  ;;  %v1095_v21 = vmax.f32 %v1063_v4, %v1079_v14  ;;  %1497 = vmatpush.bf16.msk.msra.mxu1 %vm1448_vm9, %v1496_v16  ;;  %v859_v60 = vsel %vm843_vm15, 16843009, %v1835_v46  ;;  %v876_v14 = vunpack.c.0.s8 %v860_v59 }
 0x125   : > { %1676 = vpow2.f32 %v1133_v2  ;;  %v730_v26 = vmax.f32 %v698_v11, %v714_v19  ;;  %v742_v2 = vsub.f32 0.0, %v726_v54  ;;  %v875_v10 = vunpack.c.0.s8 %v859_v60 }
 0x126   : > { %v1111_v27 = vsub.f32 0.0, %v1095_v21  ;;  %vm2374_vm7 = vcmp.ne.s32.totalorder %v876_v14, 0 }
 0x127   : > { %v746_v32 = vsub.f32 0.0, %v730_v26  ;;  %v628_v33 = vpop.permute.xlu1 %627  ;;  %vm2370_vm6 = vcmp.ne.s32.totalorder %v875_v10, 0  ;;  %v857_v26 = vsel %vm841_vm4, 16843009, %v1835_v46 }
 0x128   : > { %v1671_v22 = vpop.eup %1670  ;;  %v1131_v13 = vmul.f32 1.442695, %v1111_v27  ;;  %v696_v36 = vadd.f32 %v2145_v15, %v628_v33  ;;  %v623_v37 = vpop.permute.xlu0 %622  ;;  %v858_v27 = vsel %vm842_vm5, 16843009, %v1835_v46  ;;  %vm1457_vm8 = vmpackc.low %vm2374_vm7, %vm2370_vm6  ;;  %v873_v35 = vunpack.c.0.s8 %v857_v26 }
 0x129   : > { %v1673_v39 = vpop.eup %1672  ;;  %v767_v40 = vmul.f32 1.442695, %v746_v32  ;;  %v695_v41 = vadd.f32 %v2145_v15, %v623_v37  ;;  %v874_v46 = vunpack.c.0.s8 %v858_v27 }
 0x12a   : > { %v1675_v18 = vpop.eup %1674  ;;  %1678 = vpow2.f32 %v1131_v13  ;;  %v712_v44 = vmul.f32 0.2, %v696_v36  ;;  %v1499_v45 = vpack.c.bf16 %v1671_v22, %v1673_v39  ;;  %vm2391_vm9 = vcmp.ne.s32.totalorder %v873_v35, 0 }
 0x12b   : > { %v1677_v48 = vpop.eup %1676  ;;  %1680 = vpow2.f32 %v767_v40  ;;  %v711_v50 = vmul.f32 0.2, %v695_v41  ;;  %vm2395_vm10 = vcmp.ne.s32.totalorder %v874_v46, 0 }
 0x12c   : > { %v728_v55 = vmax.f32 %v696_v36, %v712_v44  ;;  %1500 = vmatpush.bf16.msk.msra.mxu1 %vm1451_vm12, %v1499_v45  ;;  %v1437_v44 = vld [vmem:[%s2101_s29] sm:$0xf]  ;;  %v1519_v45 = vld [vmem:[%s2101_s29] sm:$0x10]  ;;  %vm1460_vm11 = vmpackc.low %vm2395_vm10, %vm2391_vm9 }
 0x12d   : > { %v727_v56 = vmax.f32 %v695_v41, %v711_v50 }
 0x12e   : > { %v744_v47 = vsub.f32 0.0, %v728_v55  ;;  %v1438_v55 = vor.u32 %v1519_v45, %v1437_v44 }
 0x12f   : > { %v743_v61 = vsub.f32 0.0, %v727_v56  ;;  %v613_v62 = vpop.permute.xlu1 %612 }
 0x130   : > { %v1679_v0 = vpop.eup %1678  ;;  %v763_v3 = vmul.f32 1.442695, %v744_v47  ;;  %v994_v4 = vpop.permute.xlu0 %993  ;;  %v693_v5 = vadd.f32 %v2145_v15, %v613_v62  ;;  %v759_v15 = vmul.f32 1.442695, %v742_v2  ;;  %v921_v62 = vld [vmem:[#allocation2 + $0x10] sm:$0xff] }
 0x131   : > { %v1681_v6 = vpop.eup %1680  ;;  %v761_v7 = vmul.f32 1.442695, %v743_v61  ;;  %v1062_v8 = vadd.f32 %v2151_v24, %v994_v4  ;;  %v1502_v9 = vpack.c.bf16 %v1677_v48, %v1679_v0  ;;  %v1485_v61 = vor.u32 %v1520_v49, %v1484_v57  ;;  %v1172_v0 = vld [vmem:[#allocation2 + $0x18] sm:$0xff] }
 0x132   : > { %1682 = vpow2.f32 %v763_v3  ;;  %v709_v11 = vmul.f32 0.2, %v693_v5  ;;  %v1455_v12 = vpack.c.bf16 %v1681_v6, %v1675_v18 }
 0x133   : > { %1684 = vpow2.f32 %v761_v7  ;;  %v1078_v16 = vmul.f32 0.2, %v1062_v8  ;;  %1503 = vmatpush.bf16.msk.msra.mxu1 %vm1454_vm3, %v1502_v9 }
 0x134   : > { %v725_v17 = vmax.f32 %v693_v5, %v709_v11  ;;  %1456 = vmatpush.bf16.msk.msra.mxu0 %vm1454_vm3, %v1455_v12  ;;  %1686 = vpow2.f32 %v1127_v1  ;;  %v1173_v5 = vld [vmem:[#allocation2 + $0x8] sm:$0x1] }
 0x135   : > { %v1094_v19 = vmax.f32 %v1062_v8, %v1078_v16  ;;  %1688 = vpow2.f32 %v759_v15 }
 0x136   : > { %v741_v21 = vsub.f32 0.0, %v725_v17 }
 0x137   : > { %v1110_v28 = vsub.f32 0.0, %v1094_v19  ;;  %v984_v29 = vpop.permute.xlu1 %983 }
 0x138   : > { %v1683_v30 = vpop.eup %1682  ;;  %v757_v31 = vmul.f32 1.442695, %v741_v21  ;;  %v979_v32 = vpop.permute.xlu0 %978  ;;  %v1060_v33 = vadd.f32 %v2151_v24, %v984_v29 }
 0x139   : > { %v1685_v34 = vpop.eup %1684  ;;  %v1129_v23 = vmul.f32 1.442695, %v1110_v28  ;;  %v1059_v22 = vadd.f32 %v2151_v24, %v979_v32 }
 0x13a   : > { %1690 = vpow2.f32 %v757_v31  ;;  %v1076_v13 = vmul.f32 0.2, %v1060_v33  ;;  %v1458_v36 = vpack.c.bf16 %v1683_v30, %v1685_v34  ;;  %v1687_v24 = vpop.eup %1686 }
 0x13b   : > { %1692 = vpow2.f32 %v1129_v23  ;;  %v1075_v37 = vmul.f32 0.2, %v1059_v22  ;;  %v1689_v42 = vpop.eup %1688 }
 0x13c   : > { %v1092_v38 = vmax.f32 %v1060_v33, %v1076_v13  ;;  %1459 = vmatpush.bf16.msk.msra.mxu0 %vm1457_vm8, %v1458_v36 }
 0x13d   : > { %v1091_v39 = vmax.f32 %v1059_v22, %v1075_v37 }
 0x13e   : > { %v1108_v43 = vsub.f32 0.0, %v1092_v38 }
 0x13f   : > { %v1107_v18 = vsub.f32 0.0, %v1091_v39 }
 0x140   : > { %v1691_v48 = vpop.eup %1690  ;;  %v1125_v50 = vmul.f32 1.442695, %v1108_v43 }
 0x141   : > { %v1693_v51 = vpop.eup %1692  ;;  %v1123_v52 = vmul.f32 1.442695, %v1107_v18  ;;  %v1461_v53 = vpack.c.bf16 %v1689_v42, %v1691_v48 }
 0x142   : > { %1694 = vpow2.f32 %v1125_v50  ;;  %v1505_v54 = vpack.c.bf16 %v1693_v51, %v1687_v24 }
 0x143   : > { %1696 = vpow2.f32 %v1123_v52  ;;  %1462 = vmatpush.bf16.msk.msra.mxu0 %vm1460_vm11, %v1461_v53 }
 0x144   : > { %1506 = vmatpush.bf16.msk.msra.mxu1 %vm1457_vm8, %v1505_v54 }
 0x146   : > { %947 = vmatmul.bf16.vlgmr.msra.gmra.mxu0 %v1438_v55 }
 0x148   : > { %v1695_v56 = vpop.eup %1694 }
 0x149   : > { %v1697_v47 = vpop.eup %1696 }
 0x14a   : > { %v1508_v60 = vpack.c.bf16 %v1695_v56, %v1697_v47 }
 0x14c   : > { %1509 = vmatpush.bf16.msk.msra.mxu1 %vm1460_vm11, %v1508_v60 }
 0x14f   : > { %1199 = vmatmul.bf16.vlgmr.msra.gmra.mxu1 %v1485_v61 }
 0x1c3   : > { %v948_v59 = vpop.f32.mrf.mxu0 }
 0x1c4   : > { %v953_v58 = vadd.f32 %v948_v59, %v921_v62 }
 0x1c6   : > { %955 = vst [vmem:[#allocation2 + $0x10] sm:$0xff] %v953_v58 }
 0x1cb   : > { %v950_v1 = vpop.f32.mrf.mxu0 }
 0x1cc   : > { %v954_v2 = vadd.f32 %v950_v1, %v922_v63  ;;  %v1200_v3 = vpop.f32.mrf.mxu1 }
 0x1cd   : > { %v1205_v4 = vadd.f32 %v1200_v3, %v1172_v0 }
 0x1ce   : > { %956 = vst [vmem:[#allocation2] sm:$0x1] %v954_v2 }
 0x1cf   : > { %1207 = vst [vmem:[#allocation2 + $0x18] sm:$0xff] %v1205_v4 }
 0x1d3   : > { %1212 = sbr.rel (%p1510_p8) target bundleno = 515 (0x203), region = 195 }
 0x1d4   : > { %v1202_v6 = vpop.f32.mrf.mxu1 }
 0x1d5   : > { %v1206_v7 = vadd.f32 %v1202_v6, %v1173_v5 }
 0x1d7   : > { %1208 = vst [vmem:[#allocation2 + $0x8] sm:$0x1] %v1206_v7 }
 0x1d8   : > { %v1214_v8 = vld [vmem:[#allocation2] sm:$0x1]  ;;  %v1213_v34 = vld [vmem:[#allocation2 + $0x10] sm:$0xff]  ;;  %v1215_v35 = vld [vmem:[#allocation2 + $0x18] sm:$0xff] }
 0x1d9   : > { %vm1217_vm12 = vcmp.eq.f32.partialorder %v1214_v8, 0.0 }
 0x1da   : > { %v1219_v10 = vsel %vm1217_vm12, 1.0, %v1214_v8 }
 0x1db   : > { %v1221_v11 = vperm.slane %v1219_v10, 0 }
 0x1dd   : > { %1698 = vrcp.f32 %v1221_v11  ;;  %vm1228_vm14 = vweird.f32 %v1221_v11  ;;  %v1234_v19 = vand.u32 2147483648, %v1221_v11  ;;  %v1232_v25 = vand.u32 2147483647, %v1221_v11 }
 0x1de   : > { %v1216_v9 = vld [vmem:[#allocation2 + $0x8] sm:$0x1] }
 0x1df   : > { %vm1218_vm13 = vcmp.eq.f32.partialorder %v1216_v9, 0.0  ;;  %v1235_v30 = vor.u32 1.1754944e-38, %v1234_v19  ;;  %vm1233_vm3 = vcmp.eq.f32.partialorder %v1232_v25, 8.507059e+37 }
 0x1e0   : > { %v1220_v12 = vsel %vm1218_vm13, 1.0, %v1216_v9 }
 0x1e1   : > { %v1222_v14 = vperm.slane %v1220_v12, 0 }
 0x1e3   : > { %1700 = vrcp.f32 %v1222_v14  ;;  %v1699_v16 = vpop.eup %1698  ;;  %v1249_v26 = vand.u32 2147483648, %v1222_v14  ;;  %vm1243_vm0 = vweird.f32 %v1222_v14  ;;  %v1247_v28 = vand.u32 2147483647, %v1222_v14 }
 0x1e4   : > { %v1224_v17 = vmul.f32 %v1699_v16, %v1221_v11  ;;  %vm1229_vm15 = vweird.f32 %v1699_v16 }
 0x1e5   : > { %vm1230_vm2 = vmor %vm1228_vm14, %vm1229_vm15  ;;  %v1250_v33 = vor.u32 1.1754944e-38, %v1249_v26  ;;  %vm1248_vm5 = vcmp.eq.f32.partialorder %v1247_v28, 8.507059e+37 }
 0x1e6   : > { %v1225_v21 = vsub.f32 1.0, %v1224_v17 }
 0x1e8   : > { %v1226_v29 = vmul.f32 %v1699_v16, %v1225_v21 }
 0x1e9   : > { %v1701_v15 = vpop.eup %1700 }
 0x1ea   : > { %v1239_v20 = vmul.f32 %v1701_v15, %v1222_v14  ;;  %vm1244_vm1 = vweird.f32 %v1701_v15  ;;  %v1227_v32 = vadd.f32 %v1699_v16, %v1226_v29 }
 0x1eb   : > { %vm1245_vm4 = vmor %vm1243_vm0, %vm1244_vm1 }
 0x1ec   : > { %v1240_v27 = vsub.f32 1.0, %v1239_v20  ;;  %v1231_v22 = vsel %vm1230_vm2, %v1699_v16, %v1227_v32 }
 0x1ed   : > { %v1236_v46 = vsel %vm1233_vm3, %v1235_v30, %v1231_v22 }
 0x1ee   : > { %v1241_v31 = vmul.f32 %v1701_v15, %v1240_v27  ;;  %v1237_v36 = vmul.f32 %v1236_v46, %v1213_v34 }
 0x1f0   : > { %v1242_v23 = vadd.f32 %v1701_v15, %v1241_v31  ;;  %v1255_v24 = vmul.f32 1.442695, %v1237_v36  ;;  %vm1253_vm6 = vcmp.gt.f32.partialorder %v1237_v36, 0.0 }
 0x1f2   : > { %v1246_v13 = vsel %vm1245_vm4, %v1701_v15, %v1242_v23  ;;  %1702 = vpow2.f32 %v1255_v24 }
 0x1f3   : > { %v1251_v37 = vsel %vm1248_vm5, %v1250_v33, %v1246_v13 }
 0x1f4   : > { %v1252_v38 = vmul.f32 %v1251_v37, %v1215_v35 }
 0x1f6   : > { %v1257_v39 = vmul.f32 1.442695, %v1252_v38  ;;  %vm1254_vm7 = vcmp.gt.f32.partialorder %v1252_v38, 0.0 }
 0x1f8   : > { %1704 = vpow2.f32 %v1257_v39  ;;  %v1703_v40 = vpop.eup %1702 }
 0x1f9   : > { %v1511_v42 = vadd.f32 -1.0, %v1703_v40 }
 0x1fb   : > { %v1261_v18 = vsel %vm1253_vm6, %v1237_v36, %v1511_v42 }
 0x1fc   : > { %1263 = vst [vmem:[%s2105_s14] sm:$0xff] %v1261_v18 }
 0x1fe   : > { %v1705_v41 = vpop.eup %1704 }
 0x1ff   : > { %v1512_v43 = vadd.f32 -1.0, %v1705_v41 }
 0x201   : > { %v1262_v44 = vsel %vm1254_vm7, %v1252_v38, %v1512_v43 }
 0x202   : > { %1264 = vst [vmem:[%s2105_s14 + $0x8] sm:$0xff] %v1262_v44 }
 0x203 PF: > { %s1514_s16 = sshll.u32 %s1820_s23, 3  ;;  %s1277_s10 = sshll.u32 %s2105_s14, 4  ;;  %s1278_s10 = int_to_ptr.vmem [resolvable:$true] %s1277_s10 }
 0x204   : > { %s1276_s5 = scalar_lea.hbm %s2485_s4, %s1514_s16  ;;  %s1266_s11 = scalar_lea.sflag [#allocation8], %s2091_s8 }
 0x205   : > { %s1279_s12 = sshll.u32 %s1276_s5, 4  ;;  %s1726_s23 = scalar_lea.hbm %s2485_s4, 32  ;;  %s1280_s12 = int_to_ptr.hbm [resolvable:$true] %s1279_s12 }
 0x206   : > { %s1720_s13 = sshra.s32 %s1280_s12, 4  ;;  %s1721_s13 = int_to_ptr.hbm [resolvable:$true] %s1720_s13 }
 0x207   : > { %s1722_s6 = scalar_lea.hbm %s1721_s13, 16  ;;  %p1727_p12 = scmp.lt.s32.totalorder %s1721_s13, %s2485_s4 }
 0x208   : > { %p1723_p9 = scmp.ne.s32.totalorder %s1721_s13, %s1722_s6  ;;  %p1728_p13 = scmp.lt.s32.totalorder %s1726_s23, %s1722_s6 }
 0x20a   : > { %p1724_p10 = pnand %p1723_p9, %p1982_p4  ;;  %p1729_p0 = por %p1728_p13, %p1727_p12 }
 0x20c   : > { %p1725_p11 = pneg %p1724_p10 }
 0x20e   : > { %p1730_p6 = pnand %p1729_p0, %p1725_p11 }
 0x210   : > { %1733 = shalt.err (!%p1730_p6)
}
 0x211   : > { %s1836_s8 = smov 128   ;;  %s1837_s9 = smov 256  }
 0x212   : > { %s1838_s14 = smov 8  }
 0x213   : > { %1521 = dma.vmem_to_hbm [thread:$0]  (%p1982_p4), %s1278_s10, 256, %s1280_s12, %s1266_s11, %s1836_s8, %s1837_s9, %s1838_s14  }
 0x214 PF: > { %p1527_p1 = scmp.ge.s32.totalorder %s1832_s26, 2  ;;  %s1294_s16 = sand.u32 1, %s1788_s15  }
 0x215   : > { %s1295_s18 = scalar_lea.sflag [#allocation8], %s1294_s16 }
 0x216   : > { %p1524_p2 = pnand %p1527_p1, %p1986_p5 }
 0x218   : > { %p1525_p3 = pneg %p1524_p2 }
 0x21a   : > { %1783 = dma.done.wait (%p1525_p3), %s1295_s18, 256  }
 0x21b   : > { %1785 = vsyncadd (%p1525_p3), %s1295_s18, 4294967040  ;;  %s17_s26 = sadd.s32 1, %s1832_s26   ;;  %s2538_s22 = sld [smem:[#allocation15_spill]] }
 0x21c   : > { %p14_p7 = scmp.ge.s32.totalorder %s17_s26, 6   ;;  %s2539_s30 = sld [smem:[#allocation13_spill]] }
 0x21d   : > { %s2540_s5 = sld [smem:[#allocation10_spill]]  ;;  %s2544_s15 = smov %s1808_s20 }
 0x21e   : > { %s2541_s21 = sld [smem:[#allocation14_spill]]  ;;  %s2545_s16 = smov %s1796_s17 }
 0x21f   : > { %s2542_s10 = sld [smem:[#allocation11_spill]]  ;;  %s2547_s18 = smov %s1804_s19 }
 0x220   : > { %s2543_s12 = sld [smem:[#allocation12_spill]]  ;;  %s2551_s23 = smov %s1828_s25 }
 0x221   : > { %s2546_s17 = smov %s2538_s22  ;;  %s2550_s22 = smov %s1824_s24 }
 0x222   : > { %s2548_s19 = smov %s2539_s30  ;;  %16 = sbr.rel (!%p14_p7) target bundleno = 7 (0x7), region = 263 }
 0x223   : > { %s2549_s20 = smov %s2540_s5 }
 0x225   : > { %s2552_s24 = smov %s2542_s10 }
 0x226   : > { %s2553_s25 = smov %s2543_s12 }
 0x227   :  { %1301 = vsyncpa [#allocation8], 1 }
 0x228   :  { %1303 = vsyncpa [#allocation8 + $0x1], 1 }

</bundles_post_ra>
